<compile_context>
chip_gen: v5e
topology: v5e:2x2
jax: 0.10.0
libtpu: 0.0.40
codegen_flags: <defaults>
</compile_context>

<pallas_src>
import functools
import math

import jax
import jax.numpy as jnp
from jax.experimental import pallas as pl
from jax.experimental.pallas import tpu as pltpu


# ----------------------------- helpers (traced) -----------------------------

def _layernorm(x, gamma, beta, eps):
    """nn.LayerNorm over the last dim (biased variance, eps inside rsqrt)."""
    mean = jnp.mean(x, axis=-1, keepdims=True)
    var = jnp.mean(jnp.square(x - mean), axis=-1, keepdims=True)
    return (x - mean) * jax.lax.rsqrt(var + eps) * gamma + beta


# --------------------------- fused encoder kernel ----------------------------

def _encoder_kernel(x_ref,
                    wqkv_ref, bqkv_ref,
                    wo_ref, bo_ref,
                    g1_ref, b1_ref,
                    wff1_ref, bff1_ref,
                    wff2_ref, bff2_ref,
                    g2_ref, b2_ref,
                    gn_ref, bn_ref,
                    o_ref, attn_ref,
                    *, n_layers, n_heads, eps, scale):
    """Full Encoder forward (all layers + final norm) for one batch element."""
    x = x_ref[0]                                   # [L, D], f32
    L, D = x.shape
    dk = D // n_heads

    for layer in range(n_layers):                  # static unroll (small NL)
        # --- fused Q/K/V projection: one [L, D] @ [D, 3D] MXU pass ----------
        qkv = jnp.dot(x, wqkv_ref[layer],
                      preferred_element_type=jnp.float32) + bqkv_ref[layer]
        q = qkv[:, 0 * D:1 * D]
        k = qkv[:, 1 * D:2 * D]
        v = qkv[:, 2 * D:3 * D]

        # --- per-head scaled-dot-product attention (static lane slices) -----
        ctx_parts = []
        for h in range(n_heads):
            sl = slice(h * dk, (h + 1) * dk)
            qh, kh, vh = q[:, sl], k[:, sl], v[:, sl]
            # scores[i, j] = q_i . k_j (contract head dim, no transpose)
            s = jax.lax.dot_general(qh, kh, (((1,), (1,)), ((), ())),
                                    preferred_element_type=jnp.float32) * scale
            s = s - jnp.max(s, axis=-1, keepdims=True)
            p = jnp.exp(s)
            denom = jnp.sum(p, axis=-1, keepdims=True)
            p = p * pl.reciprocal(denom, approx=True)   # divide on EUP slot
            attn_ref[0, layer, h] = p.astype(attn_ref.dtype)
            ctx_parts.append(jnp.dot(p, vh,
                                     preferred_element_type=jnp.float32))
        ctx = jnp.concatenate(ctx_parts, axis=-1)       # [L, D]

        # --- output projection + residual + LayerNorm 1 ----------------------
        new_x = jnp.dot(ctx, wo_ref[layer],
                        preferred_element_type=jnp.float32) + bo_ref[layer]
        h1 = _layernorm(x + new_x, g1_ref[layer], b1_ref[layer], eps)

        # --- FFN (1x1 convs == per-position linears) + residual + LN 2 -------
        y = jnp.dot(h1, wff1_ref[layer],
                    preferred_element_type=jnp.float32) + bff1_ref[layer]
        y = jnp.maximum(y, 0.0)                          # ReLU
        y = jnp.dot(y, wff2_ref[layer],
                    preferred_element_type=jnp.float32) + bff2_ref[layer]
        x = _layernorm(h1 + y, g2_ref[layer], b2_ref[layer], eps)

    # --- final Encoder LayerNorm ---------------------------------------------
    o_ref[0] = _layernorm(x, gn_ref[...], bn_ref[...], eps).astype(o_ref.dtype)


# ------------------------------ Encoder forward ------------------------------

def encoder_forward(x, params, eps=1e-5):
    """Mirrors Encoder.forward (conv_layers=None, norm_layer set)."""
    B, L, D = x.shape
    H = params["n_heads"]
    NL = params["w_qkv"].shape[0]
    d_ff = params["w_ff1"].shape[-1]
    scale = 1.0 / math.sqrt(D // H)

    kern = functools.partial(_encoder_kernel,
                             n_layers=NL, n_heads=H, eps=eps, scale=scale)

    # All encoder weights are tiny (~70 KB fp32 at D=32, d_ff=64, NL=2) ->
    # keep the full stacks VMEM-resident, broadcast across the batch grid.
    weights = [
        params["w_qkv"],                            # [NL, D, 3D]
        params["b_qkv"].reshape(NL, 1, 3 * D),
        params["wo"],                               # [NL, D, D]
        params["bo"].reshape(NL, 1, D),
        params["g1"].reshape(NL, 1, D),
        params["b1"].reshape(NL, 1, D),
        params["w_ff1"],                            # [NL, D, d_ff]
        params["b_ff1"].reshape(NL, 1, d_ff),
        params["w_ff2"],                            # [NL, d_ff, D]
        params["b_ff2"].reshape(NL, 1, D),
        params["g2"].reshape(NL, 1, D),
        params["b2"].reshape(NL, 1, D),
        params["norm_g"].reshape(1, D),
        params["norm_b"].reshape(1, D),
    ]

    def _w_spec(w):
        nd = w.ndim
        return pl.BlockSpec(w.shape, lambda i, _nd=nd: (0,) * _nd)

    in_specs = [pl.BlockSpec((1, L, D), lambda i: (i, 0, 0))]
    in_specs += [_w_spec(w) for w in weights]

    out, attn = pl.pallas_call(
        kern,
        out_shape=(jax.ShapeDtypeStruct((B, L, D), x.dtype),
                   jax.ShapeDtypeStruct((B, NL, H, L, L), x.dtype)),
        grid=(B,),
        in_specs=in_specs,
        out_specs=(pl.BlockSpec((1, L, D), lambda i: (i, 0, 0)),
                   pl.BlockSpec((1, NL, H, L, L),
                                lambda i: (i, 0, 0, 0, 0))),
        compiler_params=pltpu.CompilerParams(
            dimension_semantics=("parallel",)),
    )(x, *weights)

    attns = [attn[:, l] for l in range(NL)]         # per-layer list (as torch)
    return out, attns


# --------------------------- pure-JAX reference ------------------------------

def encoder_reference(x, params, eps=1e-5):
    B, L, D = x.shape
    H = params["n_heads"]
    NL = params["w_qkv"].shape[0]
    dk = D // H
    scale = 1.0 / math.sqrt(dk)
    attns = []
    for l in range(NL):
        qkv = x @ params["w_qkv"][l] + params["b_qkv"][l]
        q, k, v = qkv[..., :D], qkv[..., D:2 * D], qkv[..., 2 * D:]
        q = q.reshape(B, L, H, dk).transpose(0, 2, 1, 3)
        k = k.reshape(B, L, H, dk).transpose(0, 2, 1, 3)
        v = v.reshape(B, L, H, dk).transpose(0, 2, 1, 3)
        s = jnp.einsum("bhqd,bhkd->bhqk", q, k) * scale
        p = jax.nn.softmax(s, axis=-1)
        attns.append(p)
        ctx = jnp.einsum("bhqk,bhkd->bhqd", p, v)
        ctx = ctx.transpose(0, 2, 1, 3).reshape(B, L, D)
        new_x = ctx @ params["wo"][l] + params["bo"][l]
        h1 = _layernorm(x + new_x, params["g1"][l], params["b1"][l], eps)
        y = jnp.maximum(h1 @ params["w_ff1"][l] + params["b_ff1"][l], 0.0)
        y = y @ params["w_ff2"][l] + params["b_ff2"][l]
        x = _layernorm(h1 + y, params["g2"][l], params["b2"][l], eps)
    x = _layernorm(x, params["norm_g"], params["norm_b"], eps)
    return x, attns


# --------------------------- Parameter creation ------------------------------

def make_params(key, n_layers, d_model, n_heads, d_ff):
    w_qkv, wo, w_ff1, w_ff2 = [], [], [], []
    for _ in range(n_layers):
        keys = jax.random.split(key, 7)
        key = keys[-1]
        s = 1.0 / math.sqrt(d_model)
        wq = jax.random.normal(keys[0], (d_model, d_model), jnp.float32) * s
        wk = jax.random.normal(keys[1], (d_model, d_model), jnp.float32) * s
        wv = jax.random.normal(keys[2], (d_model, d_model), jnp.float32) * s
        # Q|K|V weights fused into one [D, 3D] matrix (one MXU pass).
        w_qkv.append(jnp.concatenate([wq, wk, wv], axis=1))
        wo.append(jax.random.normal(keys[3], (d_model, d_model),
                                    jnp.float32) * s)
        w_ff1.append(jax.random.normal(keys[4], (d_model, d_ff),
                                       jnp.float32) * s)
        w_ff2.append(jax.random.normal(keys[5], (d_ff, d_model), jnp.float32)
                     * (1.0 / math.sqrt(d_ff)))
    return {
        "n_heads": n_heads,
        "w_qkv": jnp.stack(w_qkv),                           # [NL, D, 3D]
        "b_qkv": jnp.zeros((n_layers, 3 * d_model), jnp.float32),
        "wo": jnp.stack(wo),                                 # [NL, D, D]
        "bo": jnp.zeros((n_layers, d_model), jnp.float32),
        "w_ff1": jnp.stack(w_ff1),                           # [NL, D, d_ff]
        "b_ff1": jnp.zeros((n_layers, d_ff), jnp.float32),
        "w_ff2": jnp.stack(w_ff2),                           # [NL, d_ff, D]
        "b_ff2": jnp.zeros((n_layers, d_model), jnp.float32),
        "g1": jnp.ones((n_layers, d_model), jnp.float32),
        "b1": jnp.zeros((n_layers, d_model), jnp.float32),
        "g2": jnp.ones((n_layers, d_model), jnp.float32),
        "b2": jnp.zeros((n_layers, d_model), jnp.float32),
        "norm_g": jnp.ones((d_model,), jnp.float32),
        "norm_b": jnp.zeros((d_model,), jnp.float32),
    }


# ----------------------------------- main -----------------------------------

if __name__ == "__main__":
    B, L, D, H, D_FF, N_LAYERS = 2, 8, 32, 4, 64, 2

    key = jax.random.PRNGKey(0)
    k_x, k_p = jax.random.split(key)
    x = jax.random.normal(k_x, (B, L, D), jnp.float32)
    params = make_params(k_p, N_LAYERS, D, H, D_FF)

    out, attns = encoder_forward(x, params)
    out = jax.block_until_ready(out)
    attns = [jax.block_until_ready(a) for a in attns]

    assert out.shape == (B, L, D)
    assert len(attns) == N_LAYERS
    assert all(a.shape == (B, H, L, L) for a in attns)
    assert bool(jnp.all(jnp.isfinite(out)))

    # Correctness vs. pure-JAX reference (generous tol: approx reciprocal).
    ref_out, ref_attns = encoder_reference(x, params)
    assert float(jnp.max(jnp.abs(out - ref_out))) < 5e-2
    for a, ra in zip(attns, ref_attns):
        assert float(jnp.max(jnp.abs(a - ra))) < 5e-2

    print("KERNEL_OK")
</pallas_src>

<mosaic_0001>
module attributes {stable_mosaic.version = 11 : i64} {
  func.func @_encoder_kernel(%arg0: i32, %arg1: memref<1x8x32xf32, #tpu.memory_space<vmem>>, %arg2: memref<2x32x96xf32, #tpu.memory_space<vmem>>, %arg3: memref<2x1x96xf32, #tpu.memory_space<vmem>>, %arg4: memref<2x32x32xf32, #tpu.memory_space<vmem>>, %arg5: memref<2x1x32xf32, #tpu.memory_space<vmem>>, %arg6: memref<2x1x32xf32, #tpu.memory_space<vmem>>, %arg7: memref<2x1x32xf32, #tpu.memory_space<vmem>>, %arg8: memref<2x32x64xf32, #tpu.memory_space<vmem>>, %arg9: memref<2x1x64xf32, #tpu.memory_space<vmem>>, %arg10: memref<2x64x32xf32, #tpu.memory_space<vmem>>, %arg11: memref<2x1x32xf32, #tpu.memory_space<vmem>>, %arg12: memref<2x1x32xf32, #tpu.memory_space<vmem>>, %arg13: memref<2x1x32xf32, #tpu.memory_space<vmem>>, %arg14: memref<1x32xf32, #tpu.memory_space<vmem>>, %arg15: memref<1x32xf32, #tpu.memory_space<vmem>>, %arg16: memref<1x8x32xf32, #tpu.memory_space<vmem>>, %arg17: memref<1x2x4x8x8xf32, #tpu.memory_space<vmem>>) attributes {dimension_semantics = [#tpu.dimension_semantics<parallel>], iteration_bounds = array<i64: 2>, scalar_prefetch = 0 : i64, scratch_operands = 0 : i64, tpu.core_type = #tpu.core_type<tc>, window_params = [{transform_indices = @transform_0, window_bounds = array<i64: 1, 8, 32>}, {pipeline_mode = #tpu.pipeline_mode<synchronous>, transform_indices = @transform_1, window_bounds = array<i64: 2, 32, 96>}, {pipeline_mode = #tpu.pipeline_mode<synchronous>, transform_indices = @transform_2, window_bounds = array<i64: 2, 1, 96>}, {pipeline_mode = #tpu.pipeline_mode<synchronous>, transform_indices = @transform_3, window_bounds = array<i64: 2, 32, 32>}, {pipeline_mode = #tpu.pipeline_mode<synchronous>, transform_indices = @transform_4, window_bounds = array<i64: 2, 1, 32>}, {pipeline_mode = #tpu.pipeline_mode<synchronous>, transform_indices = @transform_5, window_bounds = array<i64: 2, 1, 32>}, {pipeline_mode = #tpu.pipeline_mode<synchronous>, transform_indices = @transform_6, window_bounds = array<i64: 2, 1, 32>}, {pipeline_mode = #tpu.pipeline_mode<synchronous>, transform_indices = @transform_7, window_bounds = array<i64: 2, 32, 64>}, {pipeline_mode = #tpu.pipeline_mode<synchronous>, transform_indices = @transform_8, window_bounds = array<i64: 2, 1, 64>}, {pipeline_mode = #tpu.pipeline_mode<synchronous>, transform_indices = @transform_9, window_bounds = array<i64: 2, 64, 32>}, {pipeline_mode = #tpu.pipeline_mode<synchronous>, transform_indices = @transform_10, window_bounds = array<i64: 2, 1, 32>}, {pipeline_mode = #tpu.pipeline_mode<synchronous>, transform_indices = @transform_11, window_bounds = array<i64: 2, 1, 32>}, {pipeline_mode = #tpu.pipeline_mode<synchronous>, transform_indices = @transform_12, window_bounds = array<i64: 2, 1, 32>}, {pipeline_mode = #tpu.pipeline_mode<synchronous>, transform_indices = @transform_13, window_bounds = array<i64: 1, 32>}, {pipeline_mode = #tpu.pipeline_mode<synchronous>, transform_indices = @transform_14, window_bounds = array<i64: 1, 32>}, {transform_indices = @transform_15, window_bounds = array<i64: 1, 8, 32>}, {transform_indices = @transform_16, window_bounds = array<i64: 1, 2, 4, 8, 8>}]} {
    %c0 = arith.constant 0 : index
    %c0_0 = arith.constant 0 : index
    %c0_1 = arith.constant 0 : index
    %0 = vector.load %arg1[%c0, %c0_0, %c0_1] : memref<1x8x32xf32, #tpu.memory_space<vmem>>, vector<1x8x32xf32>
    %1 = vector.shape_cast %0 : vector<1x8x32xf32> to vector<8x32xf32>
    %c0_2 = arith.constant 0 : index
    %c0_3 = arith.constant 0 : index
    %c0_4 = arith.constant 0 : index
    %2 = vector.load %arg2[%c0_2, %c0_3, %c0_4] : memref<2x32x96xf32, #tpu.memory_space<vmem>>, vector<1x32x96xf32>
    %3 = vector.shape_cast %2 : vector<1x32x96xf32> to vector<32x96xf32>
    %cst = arith.constant dense<0.000000e+00> : vector<8x96xf32>
    %4 = tpu.matmul %1, %3, %cst {dimension_numbers = #tpu.dot_dimension_numbers<[1], [0], [0], [1], [0, 0, 1, 1], [], []>} : vector<8x32xf32>, vector<32x96xf32>, vector<8x96xf32> -> vector<8x96xf32>
    %c0_5 = arith.constant 0 : index
    %c0_6 = arith.constant 0 : index
    %c0_7 = arith.constant 0 : index
    %5 = vector.load %arg3[%c0_5, %c0_6, %c0_7] : memref<2x1x96xf32, #tpu.memory_space<vmem>>, vector<1x1x96xf32>
    %6 = vector.shape_cast %5 : vector<1x1x96xf32> to vector<1x96xf32>
    %7 = vector.broadcast %6 : vector<1x96xf32> to vector<8x96xf32>
    %8 = arith.addf %4, %7 : vector<8x96xf32>
    %9 = vector.extract_strided_slice %8 {offsets = [0, 0], sizes = [8, 32], strides = [1, 1]} : vector<8x96xf32> to vector<8x32xf32>
    %10 = vector.extract_strided_slice %8 {offsets = [0, 32], sizes = [8, 32], strides = [1, 1]} : vector<8x96xf32> to vector<8x32xf32>
    %11 = vector.extract_strided_slice %8 {offsets = [0, 64], sizes = [8, 32], strides = [1, 1]} : vector<8x96xf32> to vector<8x32xf32>
    %12 = vector.extract_strided_slice %9 {offsets = [0, 0], sizes = [8, 8], strides = [1, 1]} : vector<8x32xf32> to vector<8x8xf32>
    %13 = vector.extract_strided_slice %10 {offsets = [0, 0], sizes = [8, 8], strides = [1, 1]} : vector<8x32xf32> to vector<8x8xf32>
    %14 = vector.extract_strided_slice %11 {offsets = [0, 0], sizes = [8, 8], strides = [1, 1]} : vector<8x32xf32> to vector<8x8xf32>
    %cst_8 = arith.constant dense<0.000000e+00> : vector<8x8xf32>
    %15 = tpu.matmul %12, %13, %cst_8 {dimension_numbers = #tpu.dot_dimension_numbers<[1], [1], [0], [0], [0, 0, 1, 0], [], []>} : vector<8x8xf32>, vector<8x8xf32>, vector<8x8xf32> -> vector<8x8xf32>
    %cst_9 = arith.constant 0.353553385 : f32
    %16 = vector.broadcast %cst_9 : f32 to vector<8x8xf32>
    %17 = arith.mulf %15, %16 : vector<8x8xf32>
    %cst_10 = arith.constant dense<0xFF800000> : vector<8xf32>
    %18 = vector.multi_reduction <maximumf>, %17, %cst_10 [1] : vector<8x8xf32> to vector<8xf32>
    %19 = vector.shape_cast %18 : vector<8xf32> to vector<8x1xf32>
    %20 = vector.broadcast %19 : vector<8x1xf32> to vector<8x8xf32>
    %21 = arith.subf %17, %20 : vector<8x8xf32>
    %22 = math.exp %21 : vector<8x8xf32>
    %cst_11 = arith.constant dense<0.000000e+00> : vector<8xf32>
    %23 = vector.multi_reduction <add>, %22, %cst_11 [1] : vector<8x8xf32> to vector<8xf32>
    %24 = vector.shape_cast %23 : vector<8xf32> to vector<8x1xf32>
    %25 = tpu.reciprocal %24 {approx = true} : vector<8x1xf32> -> vector<8x1xf32>
    %26 = vector.broadcast %25 : vector<8x1xf32> to vector<8x8xf32>
    %27 = arith.mulf %22, %26 : vector<8x8xf32>
    %c0_12 = arith.constant 0 : index
    %c0_13 = arith.constant 0 : index
    %c0_14 = arith.constant 0 : index
    %c0_15 = arith.constant 0 : index
    %c0_16 = arith.constant 0 : index
    %28 = vector.load %arg17[%c0_12, %c0_13, %c0_14, %c0_15, %c0_16] : memref<1x2x4x8x8xf32, #tpu.memory_space<vmem>>, vector<1x1x1x8x8xf32>
    %29 = vector.shape_cast %28 : vector<1x1x1x8x8xf32> to vector<8x8xf32>
    %30 = vector.shape_cast %27 : vector<8x8xf32> to vector<1x1x1x8x8xf32>
    tpu.vector_store %arg17[%c0_12, %c0_13, %c0_14, %c0_15, %c0_16], %30 {strides = array<i32>} : memref<1x2x4x8x8xf32, #tpu.memory_space<vmem>>, vector<1x1x1x8x8xf32>,
    %cst_17 = arith.constant dense<0.000000e+00> : vector<8x8xf32>
    %31 = tpu.matmul %27, %14, %cst_17 {dimension_numbers = #tpu.dot_dimension_numbers<[1], [0], [0], [1], [0, 0, 1, 1], [], []>} : vector<8x8xf32>, vector<8x8xf32>, vector<8x8xf32> -> vector<8x8xf32>
    %32 = vector.extract_strided_slice %9 {offsets = [0, 8], sizes = [8, 8], strides = [1, 1]} : vector<8x32xf32> to vector<8x8xf32>
    %33 = vector.extract_strided_slice %10 {offsets = [0, 8], sizes = [8, 8], strides = [1, 1]} : vector<8x32xf32> to vector<8x8xf32>
    %34 = vector.extract_strided_slice %11 {offsets = [0, 8], sizes = [8, 8], strides = [1, 1]} : vector<8x32xf32> to vector<8x8xf32>
    %cst_18 = arith.constant dense<0.000000e+00> : vector<8x8xf32>
    %35 = tpu.matmul %32, %33, %cst_18 {dimension_numbers = #tpu.dot_dimension_numbers<[1], [1], [0], [0], [0, 0, 1, 0], [], []>} : vector<8x8xf32>, vector<8x8xf32>, vector<8x8xf32> -> vector<8x8xf32>
    %cst_19 = arith.constant 0.353553385 : f32
    %36 = vector.broadcast %cst_19 : f32 to vector<8x8xf32>
    %37 = arith.mulf %35, %36 : vector<8x8xf32>
    %cst_20 = arith.constant dense<0xFF800000> : vector<8xf32>
    %38 = vector.multi_reduction <maximumf>, %37, %cst_20 [1] : vector<8x8xf32> to vector<8xf32>
    %39 = vector.shape_cast %38 : vector<8xf32> to vector<8x1xf32>
    %40 = vector.broadcast %39 : vector<8x1xf32> to vector<8x8xf32>
    %41 = arith.subf %37, %40 : vector<8x8xf32>
    %42 = math.exp %41 : vector<8x8xf32>
    %cst_21 = arith.constant dense<0.000000e+00> : vector<8xf32>
    %43 = vector.multi_reduction <add>, %42, %cst_21 [1] : vector<8x8xf32> to vector<8xf32>
    %44 = vector.shape_cast %43 : vector<8xf32> to vector<8x1xf32>
    %45 = tpu.reciprocal %44 {approx = true} : vector<8x1xf32> -> vector<8x1xf32>
    %46 = vector.broadcast %45 : vector<8x1xf32> to vector<8x8xf32>
    %47 = arith.mulf %42, %46 : vector<8x8xf32>
    %c0_22 = arith.constant 0 : index
    %c0_23 = arith.constant 0 : index
    %c1 = arith.constant 1 : index
    %c0_24 = arith.constant 0 : index
    %c0_25 = arith.constant 0 : index
    %48 = vector.load %arg17[%c0_22, %c0_23, %c1, %c0_24, %c0_25] : memref<1x2x4x8x8xf32, #tpu.memory_space<vmem>>, vector<1x1x1x8x8xf32>
    %49 = vector.shape_cast %48 : vector<1x1x1x8x8xf32> to vector<8x8xf32>
    %50 = vector.shape_cast %47 : vector<8x8xf32> to vector<1x1x1x8x8xf32>
    tpu.vector_store %arg17[%c0_22, %c0_23, %c1, %c0_24, %c0_25], %50 {strides = array<i32>} : memref<1x2x4x8x8xf32, #tpu.memory_space<vmem>>, vector<1x1x1x8x8xf32>,
    %cst_26 = arith.constant dense<0.000000e+00> : vector<8x8xf32>
    %51 = tpu.matmul %47, %34, %cst_26 {dimension_numbers = #tpu.dot_dimension_numbers<[1], [0], [0], [1], [0, 0, 1, 1], [], []>} : vector<8x8xf32>, vector<8x8xf32>, vector<8x8xf32> -> vector<8x8xf32>
    %52 = vector.extract_strided_slice %9 {offsets = [0, 16], sizes = [8, 8], strides = [1, 1]} : vector<8x32xf32> to vector<8x8xf32>
    %53 = vector.extract_strided_slice %10 {offsets = [0, 16], sizes = [8, 8], strides = [1, 1]} : vector<8x32xf32> to vector<8x8xf32>
    %54 = vector.extract_strided_slice %11 {offsets = [0, 16], sizes = [8, 8], strides = [1, 1]} : vector<8x32xf32> to vector<8x8xf32>
    %cst_27 = arith.constant dense<0.000000e+00> : vector<8x8xf32>
    %55 = tpu.matmul %52, %53, %cst_27 {dimension_numbers = #tpu.dot_dimension_numbers<[1], [1], [0], [0], [0, 0, 1, 0], [], []>} : vector<8x8xf32>, vector<8x8xf32>, vector<8x8xf32> -> vector<8x8xf32>
    %cst_28 = arith.constant 0.353553385 : f32
    %56 = vector.broadcast %cst_28 : f32 to vector<8x8xf32>
    %57 = arith.mulf %55, %56 : vector<8x8xf32>
    %cst_29 = arith.constant dense<0xFF800000> : vector<8xf32>
    %58 = vector.multi_reduction <maximumf>, %57, %cst_29 [1] : vector<8x8xf32> to vector<8xf32>
    %59 = vector.shape_cast %58 : vector<8xf32> to vector<8x1xf32>
    %60 = vector.broadcast %59 : vector<8x1xf32> to vector<8x8xf32>
    %61 = arith.subf %57, %60 : vector<8x8xf32>
    %62 = math.exp %61 : vector<8x8xf32>
    %cst_30 = arith.constant dense<0.000000e+00> : vector<8xf32>
    %63 = vector.multi_reduction <add>, %62, %cst_30 [1] : vector<8x8xf32> to vector<8xf32>
    %64 = vector.shape_cast %63 : vector<8xf32> to vector<8x1xf32>
    %65 = tpu.reciprocal %64 {approx = true} : vector<8x1xf32> -> vector<8x1xf32>
    %66 = vector.broadcast %65 : vector<8x1xf32> to vector<8x8xf32>
    %67 = arith.mulf %62, %66 : vector<8x8xf32>
    %c0_31 = arith.constant 0 : index
    %c0_32 = arith.constant 0 : index
    %c2 = arith.constant 2 : index
    %c0_33 = arith.constant 0 : index
    %c0_34 = arith.constant 0 : index
    %68 = vector.load %arg17[%c0_31, %c0_32, %c2, %c0_33, %c0_34] : memref<1x2x4x8x8xf32, #tpu.memory_space<vmem>>, vector<1x1x1x8x8xf32>
    %69 = vector.shape_cast %68 : vector<1x1x1x8x8xf32> to vector<8x8xf32>
    %70 = vector.shape_cast %67 : vector<8x8xf32> to vector<1x1x1x8x8xf32>
    tpu.vector_store %arg17[%c0_31, %c0_32, %c2, %c0_33, %c0_34], %70 {strides = array<i32>} : memref<1x2x4x8x8xf32, #tpu.memory_space<vmem>>, vector<1x1x1x8x8xf32>,
    %cst_35 = arith.constant dense<0.000000e+00> : vector<8x8xf32>
    %71 = tpu.matmul %67, %54, %cst_35 {dimension_numbers = #tpu.dot_dimension_numbers<[1], [0], [0], [1], [0, 0, 1, 1], [], []>} : vector<8x8xf32>, vector<8x8xf32>, vector<8x8xf32> -> vector<8x8xf32>
    %72 = vector.extract_strided_slice %9 {offsets = [0, 24], sizes = [8, 8], strides = [1, 1]} : vector<8x32xf32> to vector<8x8xf32>
    %73 = vector.extract_strided_slice %10 {offsets = [0, 24], sizes = [8, 8], strides = [1, 1]} : vector<8x32xf32> to vector<8x8xf32>
    %74 = vector.extract_strided_slice %11 {offsets = [0, 24], sizes = [8, 8], strides = [1, 1]} : vector<8x32xf32> to vector<8x8xf32>
    %cst_36 = arith.constant dense<0.000000e+00> : vector<8x8xf32>
    %75 = tpu.matmul %72, %73, %cst_36 {dimension_numbers = #tpu.dot_dimension_numbers<[1], [1], [0], [0], [0, 0, 1, 0], [], []>} : vector<8x8xf32>, vector<8x8xf32>, vector<8x8xf32> -> vector<8x8xf32>
    %cst_37 = arith.constant 0.353553385 : f32
    %76 = vector.broadcast %cst_37 : f32 to vector<8x8xf32>
    %77 = arith.mulf %75, %76 : vector<8x8xf32>
    %cst_38 = arith.constant dense<0xFF800000> : vector<8xf32>
    %78 = vector.multi_reduction <maximumf>, %77, %cst_38 [1] : vector<8x8xf32> to vector<8xf32>
    %79 = vector.shape_cast %78 : vector<8xf32> to vector<8x1xf32>
    %80 = vector.broadcast %79 : vector<8x1xf32> to vector<8x8xf32>
    %81 = arith.subf %77, %80 : vector<8x8xf32>
    %82 = math.exp %81 : vector<8x8xf32>
    %cst_39 = arith.constant dense<0.000000e+00> : vector<8xf32>
    %83 = vector.multi_reduction <add>, %82, %cst_39 [1] : vector<8x8xf32> to vector<8xf32>
    %84 = vector.shape_cast %83 : vector<8xf32> to vector<8x1xf32>
    %85 = tpu.reciprocal %84 {approx = true} : vector<8x1xf32> -> vector<8x1xf32>
    %86 = vector.broadcast %85 : vector<8x1xf32> to vector<8x8xf32>
    %87 = arith.mulf %82, %86 : vector<8x8xf32>
    %c0_40 = arith.constant 0 : index
    %c0_41 = arith.constant 0 : index
    %c3 = arith.constant 3 : index
    %c0_42 = arith.constant 0 : index
    %c0_43 = arith.constant 0 : index
    %88 = vector.load %arg17[%c0_40, %c0_41, %c3, %c0_42, %c0_43] : memref<1x2x4x8x8xf32, #tpu.memory_space<vmem>>, vector<1x1x1x8x8xf32>
    %89 = vector.shape_cast %88 : vector<1x1x1x8x8xf32> to vector<8x8xf32>
    %90 = vector.shape_cast %87 : vector<8x8xf32> to vector<1x1x1x8x8xf32>
    tpu.vector_store %arg17[%c0_40, %c0_41, %c3, %c0_42, %c0_43], %90 {strides = array<i32>} : memref<1x2x4x8x8xf32, #tpu.memory_space<vmem>>, vector<1x1x1x8x8xf32>,
    %cst_44 = arith.constant dense<0.000000e+00> : vector<8x8xf32>
    %91 = tpu.matmul %87, %74, %cst_44 {dimension_numbers = #tpu.dot_dimension_numbers<[1], [0], [0], [1], [0, 0, 1, 1], [], []>} : vector<8x8xf32>, vector<8x8xf32>, vector<8x8xf32> -> vector<8x8xf32>
    %92 = tpu.concatenate %31, %51, %71, %91 in 1 : vector<8x8xf32>, vector<8x8xf32>, vector<8x8xf32>, vector<8x8xf32> -> vector<8x32xf32>
    %c0_45 = arith.constant 0 : index
    %c0_46 = arith.constant 0 : index
    %c0_47 = arith.constant 0 : index
    %93 = vector.load %arg4[%c0_45, %c0_46, %c0_47] : memref<2x32x32xf32, #tpu.memory_space<vmem>>, vector<1x32x32xf32>
    %94 = vector.shape_cast %93 : vector<1x32x32xf32> to vector<32x32xf32>
    %cst_48 = arith.constant dense<0.000000e+00> : vector<8x32xf32>
    %95 = tpu.matmul %92, %94, %cst_48 {dimension_numbers = #tpu.dot_dimension_numbers<[1], [0], [0], [1], [0, 0, 1, 1], [], []>} : vector<8x32xf32>, vector<32x32xf32>, vector<8x32xf32> -> vector<8x32xf32>
    %c0_49 = arith.constant 0 : index
    %c0_50 = arith.constant 0 : index
    %c0_51 = arith.constant 0 : index
    %96 = vector.load %arg5[%c0_49, %c0_50, %c0_51] : memref<2x1x32xf32, #tpu.memory_space<vmem>>, vector<1x1x32xf32>
    %97 = vector.shape_cast %96 : vector<1x1x32xf32> to vector<1x32xf32>
    %98 = vector.broadcast %97 : vector<1x32xf32> to vector<8x32xf32>
    %99 = arith.addf %95, %98 : vector<8x32xf32>
    %100 = arith.addf %1, %99 : vector<8x32xf32>
    %c0_52 = arith.constant 0 : index
    %c0_53 = arith.constant 0 : index
    %c0_54 = arith.constant 0 : index
    %101 = vector.load %arg6[%c0_52, %c0_53, %c0_54] : memref<2x1x32xf32, #tpu.memory_space<vmem>>, vector<1x1x32xf32>
    %102 = vector.shape_cast %101 : vector<1x1x32xf32> to vector<1x32xf32>
    %c0_55 = arith.constant 0 : index
    %c0_56 = arith.constant 0 : index
    %c0_57 = arith.constant 0 : index
    %103 = vector.load %arg7[%c0_55, %c0_56, %c0_57] : memref<2x1x32xf32, #tpu.memory_space<vmem>>, vector<1x1x32xf32>
    %104 = vector.shape_cast %103 : vector<1x1x32xf32> to vector<1x32xf32>
    %cst_58 = arith.constant dense<0.000000e+00> : vector<8xf32>
    %105 = vector.multi_reduction <add>, %100, %cst_58 [1] : vector<8x32xf32> to vector<8xf32>
    %106 = vector.shape_cast %105 : vector<8xf32> to vector<8x1xf32>
    %cst_59 = arith.constant 3.200000e+01 : f32
    %107 = vector.broadcast %cst_59 : f32 to vector<8x1xf32>
    %108 = arith.divf %106, %107 : vector<8x1xf32>
    %109 = vector.broadcast %108 : vector<8x1xf32> to vector<8x32xf32>
    %110 = arith.subf %100, %109 : vector<8x32xf32>
    %111 = arith.mulf %110, %110 : vector<8x32xf32>
    %cst_60 = arith.constant dense<0.000000e+00> : vector<8xf32>
    %112 = vector.multi_reduction <add>, %111, %cst_60 [1] : vector<8x32xf32> to vector<8xf32>
    %113 = vector.shape_cast %112 : vector<8xf32> to vector<8x1xf32>
    %cst_61 = arith.constant 3.200000e+01 : f32
    %114 = vector.broadcast %cst_61 : f32 to vector<8x1xf32>
    %115 = arith.divf %113, %114 : vector<8x1xf32>
    %116 = vector.broadcast %108 : vector<8x1xf32> to vector<8x32xf32>
    %117 = arith.subf %100, %116 : vector<8x32xf32>
    %cst_62 = arith.constant 9.99999974E-6 : f32
    %118 = vector.broadcast %cst_62 : f32 to vector<8x1xf32>
    %119 = arith.addf %115, %118 : vector<8x1xf32>
    %120 = math.rsqrt %119 : vector<8x1xf32>
    %121 = vector.broadcast %120 : vector<8x1xf32> to vector<8x32xf32>
    %122 = arith.mulf %117, %121 : vector<8x32xf32>
    %123 = vector.broadcast %102 : vector<1x32xf32> to vector<8x32xf32>
    %124 = arith.mulf %122, %123 : vector<8x32xf32>
    %125 = vector.broadcast %104 : vector<1x32xf32> to vector<8x32xf32>
    %126 = arith.addf %124, %125 : vector<8x32xf32>
    %c0_63 = arith.constant 0 : index
    %c0_64 = arith.constant 0 : index
    %c0_65 = arith.constant 0 : index
    %127 = vector.load %arg8[%c0_63, %c0_64, %c0_65] : memref<2x32x64xf32, #tpu.memory_space<vmem>>, vector<1x32x64xf32>
    %128 = vector.shape_cast %127 : vector<1x32x64xf32> to vector<32x64xf32>
    %cst_66 = arith.constant dense<0.000000e+00> : vector<8x64xf32>
    %129 = tpu.matmul %126, %128, %cst_66 {dimension_numbers = #tpu.dot_dimension_numbers<[1], [0], [0], [1], [0, 0, 1, 1], [], []>} : vector<8x32xf32>, vector<32x64xf32>, vector<8x64xf32> -> vector<8x64xf32>
    %c0_67 = arith.constant 0 : index
    %c0_68 = arith.constant 0 : index
    %c0_69 = arith.constant 0 : index
    %130 = vector.load %arg9[%c0_67, %c0_68, %c0_69] : memref<2x1x64xf32, #tpu.memory_space<vmem>>, vector<1x1x64xf32>
    %131 = vector.shape_cast %130 : vector<1x1x64xf32> to vector<1x64xf32>
    %132 = vector.broadcast %131 : vector<1x64xf32> to vector<8x64xf32>
    %133 = arith.addf %129, %132 : vector<8x64xf32>
    %cst_70 = arith.constant 0.000000e+00 : f32
    %134 = vector.broadcast %cst_70 : f32 to vector<8x64xf32>
    %135 = arith.maximumf %133, %134 : vector<8x64xf32>
    %c0_71 = arith.constant 0 : index
    %c0_72 = arith.constant 0 : index
    %c0_73 = arith.constant 0 : index
    %136 = vector.load %arg10[%c0_71, %c0_72, %c0_73] : memref<2x64x32xf32, #tpu.memory_space<vmem>>, vector<1x64x32xf32>
    %137 = vector.shape_cast %136 : vector<1x64x32xf32> to vector<64x32xf32>
    %cst_74 = arith.constant dense<0.000000e+00> : vector<8x32xf32>
    %138 = tpu.matmul %135, %137, %cst_74 {dimension_numbers = #tpu.dot_dimension_numbers<[1], [0], [0], [1], [0, 0, 1, 1], [], []>} : vector<8x64xf32>, vector<64x32xf32>, vector<8x32xf32> -> vector<8x32xf32>
    %c0_75 = arith.constant 0 : index
    %c0_76 = arith.constant 0 : index
    %c0_77 = arith.constant 0 : index
    %139 = vector.load %arg11[%c0_75, %c0_76, %c0_77] : memref<2x1x32xf32, #tpu.memory_space<vmem>>, vector<1x1x32xf32>
    %140 = vector.shape_cast %139 : vector<1x1x32xf32> to vector<1x32xf32>
    %141 = vector.broadcast %140 : vector<1x32xf32> to vector<8x32xf32>
    %142 = arith.addf %138, %141 : vector<8x32xf32>
    %143 = arith.addf %126, %142 : vector<8x32xf32>
    %c0_78 = arith.constant 0 : index
    %c0_79 = arith.constant 0 : index
    %c0_80 = arith.constant 0 : index
    %144 = vector.load %arg12[%c0_78, %c0_79, %c0_80] : memref<2x1x32xf32, #tpu.memory_space<vmem>>, vector<1x1x32xf32>
    %145 = vector.shape_cast %144 : vector<1x1x32xf32> to vector<1x32xf32>
    %c0_81 = arith.constant 0 : index
    %c0_82 = arith.constant 0 : index
    %c0_83 = arith.constant 0 : index
    %146 = vector.load %arg13[%c0_81, %c0_82, %c0_83] : memref<2x1x32xf32, #tpu.memory_space<vmem>>, vector<1x1x32xf32>
    %147 = vector.shape_cast %146 : vector<1x1x32xf32> to vector<1x32xf32>
    %cst_84 = arith.constant dense<0.000000e+00> : vector<8xf32>
    %148 = vector.multi_reduction <add>, %143, %cst_84 [1] : vector<8x32xf32> to vector<8xf32>
    %149 = vector.shape_cast %148 : vector<8xf32> to vector<8x1xf32>
    %cst_85 = arith.constant 3.200000e+01 : f32
    %150 = vector.broadcast %cst_85 : f32 to vector<8x1xf32>
    %151 = arith.divf %149, %150 : vector<8x1xf32>
    %152 = vector.broadcast %151 : vector<8x1xf32> to vector<8x32xf32>
    %153 = arith.subf %143, %152 : vector<8x32xf32>
    %154 = arith.mulf %153, %153 : vector<8x32xf32>
    %cst_86 = arith.constant dense<0.000000e+00> : vector<8xf32>
    %155 = vector.multi_reduction <add>, %154, %cst_86 [1] : vector<8x32xf32> to vector<8xf32>
    %156 = vector.shape_cast %155 : vector<8xf32> to vector<8x1xf32>
    %cst_87 = arith.constant 3.200000e+01 : f32
    %157 = vector.broadcast %cst_87 : f32 to vector<8x1xf32>
    %158 = arith.divf %156, %157 : vector<8x1xf32>
    %159 = vector.broadcast %151 : vector<8x1xf32> to vector<8x32xf32>
    %160 = arith.subf %143, %159 : vector<8x32xf32>
    %cst_88 = arith.constant 9.99999974E-6 : f32
    %161 = vector.broadcast %cst_88 : f32 to vector<8x1xf32>
    %162 = arith.addf %158, %161 : vector<8x1xf32>
    %163 = math.rsqrt %162 : vector<8x1xf32>
    %164 = vector.broadcast %163 : vector<8x1xf32> to vector<8x32xf32>
    %165 = arith.mulf %160, %164 : vector<8x32xf32>
    %166 = vector.broadcast %145 : vector<1x32xf32> to vector<8x32xf32>
    %167 = arith.mulf %165, %166 : vector<8x32xf32>
    %168 = vector.broadcast %147 : vector<1x32xf32> to vector<8x32xf32>
    %169 = arith.addf %167, %168 : vector<8x32xf32>
    %c1_89 = arith.constant 1 : index
    %c0_90 = arith.constant 0 : index
    %c0_91 = arith.constant 0 : index
    %170 = vector.load %arg2[%c1_89, %c0_90, %c0_91] : memref<2x32x96xf32, #tpu.memory_space<vmem>>, vector<1x32x96xf32>
    %171 = vector.shape_cast %170 : vector<1x32x96xf32> to vector<32x96xf32>
    %cst_92 = arith.constant dense<0.000000e+00> : vector<8x96xf32>
    %172 = tpu.matmul %169, %171, %cst_92 {dimension_numbers = #tpu.dot_dimension_numbers<[1], [0], [0], [1], [0, 0, 1, 1], [], []>} : vector<8x32xf32>, vector<32x96xf32>, vector<8x96xf32> -> vector<8x96xf32>
    %c1_93 = arith.constant 1 : index
    %c0_94 = arith.constant 0 : index
    %c0_95 = arith.constant 0 : index
    %173 = vector.load %arg3[%c1_93, %c0_94, %c0_95] : memref<2x1x96xf32, #tpu.memory_space<vmem>>, vector<1x1x96xf32>
    %174 = vector.shape_cast %173 : vector<1x1x96xf32> to vector<1x96xf32>
    %175 = vector.broadcast %174 : vector<1x96xf32> to vector<8x96xf32>
    %176 = arith.addf %172, %175 : vector<8x96xf32>
    %177 = vector.extract_strided_slice %176 {offsets = [0, 0], sizes = [8, 32], strides = [1, 1]} : vector<8x96xf32> to vector<8x32xf32>
    %178 = vector.extract_strided_slice %176 {offsets = [0, 32], sizes = [8, 32], strides = [1, 1]} : vector<8x96xf32> to vector<8x32xf32>
    %179 = vector.extract_strided_slice %176 {offsets = [0, 64], sizes = [8, 32], strides = [1, 1]} : vector<8x96xf32> to vector<8x32xf32>
    %180 = vector.extract_strided_slice %177 {offsets = [0, 0], sizes = [8, 8], strides = [1, 1]} : vector<8x32xf32> to vector<8x8xf32>
    %181 = vector.extract_strided_slice %178 {offsets = [0, 0], sizes = [8, 8], strides = [1, 1]} : vector<8x32xf32> to vector<8x8xf32>
    %182 = vector.extract_strided_slice %179 {offsets = [0, 0], sizes = [8, 8], strides = [1, 1]} : vector<8x32xf32> to vector<8x8xf32>
    %cst_96 = arith.constant dense<0.000000e+00> : vector<8x8xf32>
    %183 = tpu.matmul %180, %181, %cst_96 {dimension_numbers = #tpu.dot_dimension_numbers<[1], [1], [0], [0], [0, 0, 1, 0], [], []>} : vector<8x8xf32>, vector<8x8xf32>, vector<8x8xf32> -> vector<8x8xf32>
    %cst_97 = arith.constant 0.353553385 : f32
    %184 = vector.broadcast %cst_97 : f32 to vector<8x8xf32>
    %185 = arith.mulf %183, %184 : vector<8x8xf32>
    %cst_98 = arith.constant dense<0xFF800000> : vector<8xf32>
    %186 = vector.multi_reduction <maximumf>, %185, %cst_98 [1] : vector<8x8xf32> to vector<8xf32>
    %187 = vector.shape_cast %186 : vector<8xf32> to vector<8x1xf32>
    %188 = vector.broadcast %187 : vector<8x1xf32> to vector<8x8xf32>
    %189 = arith.subf %185, %188 : vector<8x8xf32>
    %190 = math.exp %189 : vector<8x8xf32>
    %cst_99 = arith.constant dense<0.000000e+00> : vector<8xf32>
    %191 = vector.multi_reduction <add>, %190, %cst_99 [1] : vector<8x8xf32> to vector<8xf32>
    %192 = vector.shape_cast %191 : vector<8xf32> to vector<8x1xf32>
    %193 = tpu.reciprocal %192 {approx = true} : vector<8x1xf32> -> vector<8x1xf32>
    %194 = vector.broadcast %193 : vector<8x1xf32> to vector<8x8xf32>
    %195 = arith.mulf %190, %194 : vector<8x8xf32>
    %c0_100 = arith.constant 0 : index
    %c1_101 = arith.constant 1 : index
    %c0_102 = arith.constant 0 : index
    %c0_103 = arith.constant 0 : index
    %c0_104 = arith.constant 0 : index
    %196 = vector.load %arg17[%c0_100, %c1_101, %c0_102, %c0_103, %c0_104] : memref<1x2x4x8x8xf32, #tpu.memory_space<vmem>>, vector<1x1x1x8x8xf32>
    %197 = vector.shape_cast %196 : vector<1x1x1x8x8xf32> to vector<8x8xf32>
    %198 = vector.shape_cast %195 : vector<8x8xf32> to vector<1x1x1x8x8xf32>
    tpu.vector_store %arg17[%c0_100, %c1_101, %c0_102, %c0_103, %c0_104], %198 {strides = array<i32>} : memref<1x2x4x8x8xf32, #tpu.memory_space<vmem>>, vector<1x1x1x8x8xf32>,
    %cst_105 = arith.constant dense<0.000000e+00> : vector<8x8xf32>
    %199 = tpu.matmul %195, %182, %cst_105 {dimension_numbers = #tpu.dot_dimension_numbers<[1], [0], [0], [1], [0, 0, 1, 1], [], []>} : vector<8x8xf32>, vector<8x8xf32>, vector<8x8xf32> -> vector<8x8xf32>
    %200 = vector.extract_strided_slice %177 {offsets = [0, 8], sizes = [8, 8], strides = [1, 1]} : vector<8x32xf32> to vector<8x8xf32>
    %201 = vector.extract_strided_slice %178 {offsets = [0, 8], sizes = [8, 8], strides = [1, 1]} : vector<8x32xf32> to vector<8x8xf32>
    %202 = vector.extract_strided_slice %179 {offsets = [0, 8], sizes = [8, 8], strides = [1, 1]} : vector<8x32xf32> to vector<8x8xf32>
    %cst_106 = arith.constant dense<0.000000e+00> : vector<8x8xf32>
    %203 = tpu.matmul %200, %201, %cst_106 {dimension_numbers = #tpu.dot_dimension_numbers<[1], [1], [0], [0], [0, 0, 1, 0], [], []>} : vector<8x8xf32>, vector<8x8xf32>, vector<8x8xf32> -> vector<8x8xf32>
    %cst_107 = arith.constant 0.353553385 : f32
    %204 = vector.broadcast %cst_107 : f32 to vector<8x8xf32>
    %205 = arith.mulf %203, %204 : vector<8x8xf32>
    %cst_108 = arith.constant dense<0xFF800000> : vector<8xf32>
    %206 = vector.multi_reduction <maximumf>, %205, %cst_108 [1] : vector<8x8xf32> to vector<8xf32>
    %207 = vector.shape_cast %206 : vector<8xf32> to vector<8x1xf32>
    %208 = vector.broadcast %207 : vector<8x1xf32> to vector<8x8xf32>
    %209 = arith.subf %205, %208 : vector<8x8xf32>
    %210 = math.exp %209 : vector<8x8xf32>
    %cst_109 = arith.constant dense<0.000000e+00> : vector<8xf32>
    %211 = vector.multi_reduction <add>, %210, %cst_109 [1] : vector<8x8xf32> to vector<8xf32>
    %212 = vector.shape_cast %211 : vector<8xf32> to vector<8x1xf32>
    %213 = tpu.reciprocal %212 {approx = true} : vector<8x1xf32> -> vector<8x1xf32>
    %214 = vector.broadcast %213 : vector<8x1xf32> to vector<8x8xf32>
    %215 = arith.mulf %210, %214 : vector<8x8xf32>
    %c0_110 = arith.constant 0 : index
    %c1_111 = arith.constant 1 : index
    %c1_112 = arith.constant 1 : index
    %c0_113 = arith.constant 0 : index
    %c0_114 = arith.constant 0 : index
    %216 = vector.load %arg17[%c0_110, %c1_111, %c1_112, %c0_113, %c0_114] : memref<1x2x4x8x8xf32, #tpu.memory_space<vmem>>, vector<1x1x1x8x8xf32>
    %217 = vector.shape_cast %216 : vector<1x1x1x8x8xf32> to vector<8x8xf32>
    %218 = vector.shape_cast %215 : vector<8x8xf32> to vector<1x1x1x8x8xf32>
    tpu.vector_store %arg17[%c0_110, %c1_111, %c1_112, %c0_113, %c0_114], %218 {strides = array<i32>} : memref<1x2x4x8x8xf32, #tpu.memory_space<vmem>>, vector<1x1x1x8x8xf32>,
    %cst_115 = arith.constant dense<0.000000e+00> : vector<8x8xf32>
    %219 = tpu.matmul %215, %202, %cst_115 {dimension_numbers = #tpu.dot_dimension_numbers<[1], [0], [0], [1], [0, 0, 1, 1], [], []>} : vector<8x8xf32>, vector<8x8xf32>, vector<8x8xf32> -> vector<8x8xf32>
    %220 = vector.extract_strided_slice %177 {offsets = [0, 16], sizes = [8, 8], strides = [1, 1]} : vector<8x32xf32> to vector<8x8xf32>
    %221 = vector.extract_strided_slice %178 {offsets = [0, 16], sizes = [8, 8], strides = [1, 1]} : vector<8x32xf32> to vector<8x8xf32>
    %222 = vector.extract_strided_slice %179 {offsets = [0, 16], sizes = [8, 8], strides = [1, 1]} : vector<8x32xf32> to vector<8x8xf32>
    %cst_116 = arith.constant dense<0.000000e+00> : vector<8x8xf32>
    %223 = tpu.matmul %220, %221, %cst_116 {dimension_numbers = #tpu.dot_dimension_numbers<[1], [1], [0], [0], [0, 0, 1, 0], [], []>} : vector<8x8xf32>, vector<8x8xf32>, vector<8x8xf32> -> vector<8x8xf32>
    %cst_117 = arith.constant 0.353553385 : f32
    %224 = vector.broadcast %cst_117 : f32 to vector<8x8xf32>
    %225 = arith.mulf %223, %224 : vector<8x8xf32>
    %cst_118 = arith.constant dense<0xFF800000> : vector<8xf32>
    %226 = vector.multi_reduction <maximumf>, %225, %cst_118 [1] : vector<8x8xf32> to vector<8xf32>
    %227 = vector.shape_cast %226 : vector<8xf32> to vector<8x1xf32>
    %228 = vector.broadcast %227 : vector<8x1xf32> to vector<8x8xf32>
    %229 = arith.subf %225, %228 : vector<8x8xf32>
    %230 = math.exp %229 : vector<8x8xf32>
    %cst_119 = arith.constant dense<0.000000e+00> : vector<8xf32>
    %231 = vector.multi_reduction <add>, %230, %cst_119 [1] : vector<8x8xf32> to vector<8xf32>
    %232 = vector.shape_cast %231 : vector<8xf32> to vector<8x1xf32>
    %233 = tpu.reciprocal %232 {approx = true} : vector<8x1xf32> -> vector<8x1xf32>
    %234 = vector.broadcast %233 : vector<8x1xf32> to vector<8x8xf32>
    %235 = arith.mulf %230, %234 : vector<8x8xf32>
    %c0_120 = arith.constant 0 : index
    %c1_121 = arith.constant 1 : index
    %c2_122 = arith.constant 2 : index
    %c0_123 = arith.constant 0 : index
    %c0_124 = arith.constant 0 : index
    %236 = vector.load %arg17[%c0_120, %c1_121, %c2_122, %c0_123, %c0_124] : memref<1x2x4x8x8xf32, #tpu.memory_space<vmem>>, vector<1x1x1x8x8xf32>
    %237 = vector.shape_cast %236 : vector<1x1x1x8x8xf32> to vector<8x8xf32>
    %238 = vector.shape_cast %235 : vector<8x8xf32> to vector<1x1x1x8x8xf32>
    tpu.vector_store %arg17[%c0_120, %c1_121, %c2_122, %c0_123, %c0_124], %238 {strides = array<i32>} : memref<1x2x4x8x8xf32, #tpu.memory_space<vmem>>, vector<1x1x1x8x8xf32>,
    %cst_125 = arith.constant dense<0.000000e+00> : vector<8x8xf32>
    %239 = tpu.matmul %235, %222, %cst_125 {dimension_numbers = #tpu.dot_dimension_numbers<[1], [0], [0], [1], [0, 0, 1, 1], [], []>} : vector<8x8xf32>, vector<8x8xf32>, vector<8x8xf32> -> vector<8x8xf32>
    %240 = vector.extract_strided_slice %177 {offsets = [0, 24], sizes = [8, 8], strides = [1, 1]} : vector<8x32xf32> to vector<8x8xf32>
    %241 = vector.extract_strided_slice %178 {offsets = [0, 24], sizes = [8, 8], strides = [1, 1]} : vector<8x32xf32> to vector<8x8xf32>
    %242 = vector.extract_strided_slice %179 {offsets = [0, 24], sizes = [8, 8], strides = [1, 1]} : vector<8x32xf32> to vector<8x8xf32>
    %cst_126 = arith.constant dense<0.000000e+00> : vector<8x8xf32>
    %243 = tpu.matmul %240, %241, %cst_126 {dimension_numbers = #tpu.dot_dimension_numbers<[1], [1], [0], [0], [0, 0, 1, 0], [], []>} : vector<8x8xf32>, vector<8x8xf32>, vector<8x8xf32> -> vector<8x8xf32>
    %cst_127 = arith.constant 0.353553385 : f32
    %244 = vector.broadcast %cst_127 : f32 to vector<8x8xf32>
    %245 = arith.mulf %243, %244 : vector<8x8xf32>
    %cst_128 = arith.constant dense<0xFF800000> : vector<8xf32>
    %246 = vector.multi_reduction <maximumf>, %245, %cst_128 [1] : vector<8x8xf32> to vector<8xf32>
    %247 = vector.shape_cast %246 : vector<8xf32> to vector<8x1xf32>
    %248 = vector.broadcast %247 : vector<8x1xf32> to vector<8x8xf32>
    %249 = arith.subf %245, %248 : vector<8x8xf32>
    %250 = math.exp %249 : vector<8x8xf32>
    %cst_129 = arith.constant dense<0.000000e+00> : vector<8xf32>
    %251 = vector.multi_reduction <add>, %250, %cst_129 [1] : vector<8x8xf32> to vector<8xf32>
    %252 = vector.shape_cast %251 : vector<8xf32> to vector<8x1xf32>
    %253 = tpu.reciprocal %252 {approx = true} : vector<8x1xf32> -> vector<8x1xf32>
    %254 = vector.broadcast %253 : vector<8x1xf32> to vector<8x8xf32>
    %255 = arith.mulf %250, %254 : vector<8x8xf32>
    %c0_130 = arith.constant 0 : index
    %c1_131 = arith.constant 1 : index
    %c3_132 = arith.constant 3 : index
    %c0_133 = arith.constant 0 : index
    %c0_134 = arith.constant 0 : index
    %256 = vector.load %arg17[%c0_130, %c1_131, %c3_132, %c0_133, %c0_134] : memref<1x2x4x8x8xf32, #tpu.memory_space<vmem>>, vector<1x1x1x8x8xf32>
    %257 = vector.shape_cast %256 : vector<1x1x1x8x8xf32> to vector<8x8xf32>
    %258 = vector.shape_cast %255 : vector<8x8xf32> to vector<1x1x1x8x8xf32>
    tpu.vector_store %arg17[%c0_130, %c1_131, %c3_132, %c0_133, %c0_134], %258 {strides = array<i32>} : memref<1x2x4x8x8xf32, #tpu.memory_space<vmem>>, vector<1x1x1x8x8xf32>,
    %cst_135 = arith.constant dense<0.000000e+00> : vector<8x8xf32>
    %259 = tpu.matmul %255, %242, %cst_135 {dimension_numbers = #tpu.dot_dimension_numbers<[1], [0], [0], [1], [0, 0, 1, 1], [], []>} : vector<8x8xf32>, vector<8x8xf32>, vector<8x8xf32> -> vector<8x8xf32>
    %260 = tpu.concatenate %199, %219, %239, %259 in 1 : vector<8x8xf32>, vector<8x8xf32>, vector<8x8xf32>, vector<8x8xf32> -> vector<8x32xf32>
    %c1_136 = arith.constant 1 : index
    %c0_137 = arith.constant 0 : index
    %c0_138 = arith.constant 0 : index
    %261 = vector.load %arg4[%c1_136, %c0_137, %c0_138] : memref<2x32x32xf32, #tpu.memory_space<vmem>>, vector<1x32x32xf32>
    %262 = vector.shape_cast %261 : vector<1x32x32xf32> to vector<32x32xf32>
    %cst_139 = arith.constant dense<0.000000e+00> : vector<8x32xf32>
    %263 = tpu.matmul %260, %262, %cst_139 {dimension_numbers = #tpu.dot_dimension_numbers<[1], [0], [0], [1], [0, 0, 1, 1], [], []>} : vector<8x32xf32>, vector<32x32xf32>, vector<8x32xf32> -> vector<8x32xf32>
    %c1_140 = arith.constant 1 : index
    %c0_141 = arith.constant 0 : index
    %c0_142 = arith.constant 0 : index
    %264 = vector.load %arg5[%c1_140, %c0_141, %c0_142] : memref<2x1x32xf32, #tpu.memory_space<vmem>>, vector<1x1x32xf32>
    %265 = vector.shape_cast %264 : vector<1x1x32xf32> to vector<1x32xf32>
    %266 = vector.broadcast %265 : vector<1x32xf32> to vector<8x32xf32>
    %267 = arith.addf %263, %266 : vector<8x32xf32>
    %268 = arith.addf %169, %267 : vector<8x32xf32>
    %c1_143 = arith.constant 1 : index
    %c0_144 = arith.constant 0 : index
    %c0_145 = arith.constant 0 : index
    %269 = vector.load %arg6[%c1_143, %c0_144, %c0_145] : memref<2x1x32xf32, #tpu.memory_space<vmem>>, vector<1x1x32xf32>
    %270 = vector.shape_cast %269 : vector<1x1x32xf32> to vector<1x32xf32>
    %c1_146 = arith.constant 1 : index
    %c0_147 = arith.constant 0 : index
    %c0_148 = arith.constant 0 : index
    %271 = vector.load %arg7[%c1_146, %c0_147, %c0_148] : memref<2x1x32xf32, #tpu.memory_space<vmem>>, vector<1x1x32xf32>
    %272 = vector.shape_cast %271 : vector<1x1x32xf32> to vector<1x32xf32>
    %cst_149 = arith.constant dense<0.000000e+00> : vector<8xf32>
    %273 = vector.multi_reduction <add>, %268, %cst_149 [1] : vector<8x32xf32> to vector<8xf32>
    %274 = vector.shape_cast %273 : vector<8xf32> to vector<8x1xf32>
    %cst_150 = arith.constant 3.200000e+01 : f32
    %275 = vector.broadcast %cst_150 : f32 to vector<8x1xf32>
    %276 = arith.divf %274, %275 : vector<8x1xf32>
    %277 = vector.broadcast %276 : vector<8x1xf32> to vector<8x32xf32>
    %278 = arith.subf %268, %277 : vector<8x32xf32>
    %279 = arith.mulf %278, %278 : vector<8x32xf32>
    %cst_151 = arith.constant dense<0.000000e+00> : vector<8xf32>
    %280 = vector.multi_reduction <add>, %279, %cst_151 [1] : vector<8x32xf32> to vector<8xf32>
    %281 = vector.shape_cast %280 : vector<8xf32> to vector<8x1xf32>
    %cst_152 = arith.constant 3.200000e+01 : f32
    %282 = vector.broadcast %cst_152 : f32 to vector<8x1xf32>
    %283 = arith.divf %281, %282 : vector<8x1xf32>
    %284 = vector.broadcast %276 : vector<8x1xf32> to vector<8x32xf32>
    %285 = arith.subf %268, %284 : vector<8x32xf32>
    %cst_153 = arith.constant 9.99999974E-6 : f32
    %286 = vector.broadcast %cst_153 : f32 to vector<8x1xf32>
    %287 = arith.addf %283, %286 : vector<8x1xf32>
    %288 = math.rsqrt %287 : vector<8x1xf32>
    %289 = vector.broadcast %288 : vector<8x1xf32> to vector<8x32xf32>
    %290 = arith.mulf %285, %289 : vector<8x32xf32>
    %291 = vector.broadcast %270 : vector<1x32xf32> to vector<8x32xf32>
    %292 = arith.mulf %290, %291 : vector<8x32xf32>
    %293 = vector.broadcast %272 : vector<1x32xf32> to vector<8x32xf32>
    %294 = arith.addf %292, %293 : vector<8x32xf32>
    %c1_154 = arith.constant 1 : index
    %c0_155 = arith.constant 0 : index
    %c0_156 = arith.constant 0 : index
    %295 = vector.load %arg8[%c1_154, %c0_155, %c0_156] : memref<2x32x64xf32, #tpu.memory_space<vmem>>, vector<1x32x64xf32>
    %296 = vector.shape_cast %295 : vector<1x32x64xf32> to vector<32x64xf32>
    %cst_157 = arith.constant dense<0.000000e+00> : vector<8x64xf32>
    %297 = tpu.matmul %294, %296, %cst_157 {dimension_numbers = #tpu.dot_dimension_numbers<[1], [0], [0], [1], [0, 0, 1, 1], [], []>} : vector<8x32xf32>, vector<32x64xf32>, vector<8x64xf32> -> vector<8x64xf32>
    %c1_158 = arith.constant 1 : index
    %c0_159 = arith.constant 0 : index
    %c0_160 = arith.constant 0 : index
    %298 = vector.load %arg9[%c1_158, %c0_159, %c0_160] : memref<2x1x64xf32, #tpu.memory_space<vmem>>, vector<1x1x64xf32>
    %299 = vector.shape_cast %298 : vector<1x1x64xf32> to vector<1x64xf32>
    %300 = vector.broadcast %299 : vector<1x64xf32> to vector<8x64xf32>
    %301 = arith.addf %297, %300 : vector<8x64xf32>
    %cst_161 = arith.constant 0.000000e+00 : f32
    %302 = vector.broadcast %cst_161 : f32 to vector<8x64xf32>
    %303 = arith.maximumf %301, %302 : vector<8x64xf32>
    %c1_162 = arith.constant 1 : index
    %c0_163 = arith.constant 0 : index
    %c0_164 = arith.constant 0 : index
    %304 = vector.load %arg10[%c1_162, %c0_163, %c0_164] : memref<2x64x32xf32, #tpu.memory_space<vmem>>, vector<1x64x32xf32>
    %305 = vector.shape_cast %304 : vector<1x64x32xf32> to vector<64x32xf32>
    %cst_165 = arith.constant dense<0.000000e+00> : vector<8x32xf32>
    %306 = tpu.matmul %303, %305, %cst_165 {dimension_numbers = #tpu.dot_dimension_numbers<[1], [0], [0], [1], [0, 0, 1, 1], [], []>} : vector<8x64xf32>, vector<64x32xf32>, vector<8x32xf32> -> vector<8x32xf32>
    %c1_166 = arith.constant 1 : index
    %c0_167 = arith.constant 0 : index
    %c0_168 = arith.constant 0 : index
    %307 = vector.load %arg11[%c1_166, %c0_167, %c0_168] : memref<2x1x32xf32, #tpu.memory_space<vmem>>, vector<1x1x32xf32>
    %308 = vector.shape_cast %307 : vector<1x1x32xf32> to vector<1x32xf32>
    %309 = vector.broadcast %308 : vector<1x32xf32> to vector<8x32xf32>
    %310 = arith.addf %306, %309 : vector<8x32xf32>
    %311 = arith.addf %294, %310 : vector<8x32xf32>
    %c1_169 = arith.constant 1 : index
    %c0_170 = arith.constant 0 : index
    %c0_171 = arith.constant 0 : index
    %312 = vector.load %arg12[%c1_169, %c0_170, %c0_171] : memref<2x1x32xf32, #tpu.memory_space<vmem>>, vector<1x1x32xf32>
    %313 = vector.shape_cast %312 : vector<1x1x32xf32> to vector<1x32xf32>
    %c1_172 = arith.constant 1 : index
    %c0_173 = arith.constant 0 : index
    %c0_174 = arith.constant 0 : index
    %314 = vector.load %arg13[%c1_172, %c0_173, %c0_174] : memref<2x1x32xf32, #tpu.memory_space<vmem>>, vector<1x1x32xf32>
    %315 = vector.shape_cast %314 : vector<1x1x32xf32> to vector<1x32xf32>
    %cst_175 = arith.constant dense<0.000000e+00> : vector<8xf32>
    %316 = vector.multi_reduction <add>, %311, %cst_175 [1] : vector<8x32xf32> to vector<8xf32>
    %317 = vector.shape_cast %316 : vector<8xf32> to vector<8x1xf32>
    %cst_176 = arith.constant 3.200000e+01 : f32
    %318 = vector.broadcast %cst_176 : f32 to vector<8x1xf32>
    %319 = arith.divf %317, %318 : vector<8x1xf32>
    %320 = vector.broadcast %319 : vector<8x1xf32> to vector<8x32xf32>
    %321 = arith.subf %311, %320 : vector<8x32xf32>
    %322 = arith.mulf %321, %321 : vector<8x32xf32>
    %cst_177 = arith.constant dense<0.000000e+00> : vector<8xf32>
    %323 = vector.multi_reduction <add>, %322, %cst_177 [1] : vector<8x32xf32> to vector<8xf32>
    %324 = vector.shape_cast %323 : vector<8xf32> to vector<8x1xf32>
    %cst_178 = arith.constant 3.200000e+01 : f32
    %325 = vector.broadcast %cst_178 : f32 to vector<8x1xf32>
    %326 = arith.divf %324, %325 : vector<8x1xf32>
    %327 = vector.broadcast %319 : vector<8x1xf32> to vector<8x32xf32>
    %328 = arith.subf %311, %327 : vector<8x32xf32>
    %cst_179 = arith.constant 9.99999974E-6 : f32
    %329 = vector.broadcast %cst_179 : f32 to vector<8x1xf32>
    %330 = arith.addf %326, %329 : vector<8x1xf32>
    %331 = math.rsqrt %330 : vector<8x1xf32>
    %332 = vector.broadcast %331 : vector<8x1xf32> to vector<8x32xf32>
    %333 = arith.mulf %328, %332 : vector<8x32xf32>
    %334 = vector.broadcast %313 : vector<1x32xf32> to vector<8x32xf32>
    %335 = arith.mulf %333, %334 : vector<8x32xf32>
    %336 = vector.broadcast %315 : vector<1x32xf32> to vector<8x32xf32>
    %337 = arith.addf %335, %336 : vector<8x32xf32>
    %c0_180 = arith.constant 0 : index
    %c0_181 = arith.constant 0 : index
    %338 = vector.load %arg14[%c0_180, %c0_181] : memref<1x32xf32, #tpu.memory_space<vmem>>, vector<1x32xf32>
    %c0_182 = arith.constant 0 : index
    %c0_183 = arith.constant 0 : index
    %339 = vector.load %arg15[%c0_182, %c0_183] : memref<1x32xf32, #tpu.memory_space<vmem>>, vector<1x32xf32>
    %cst_184 = arith.constant dense<0.000000e+00> : vector<8xf32>
    %340 = vector.multi_reduction <add>, %337, %cst_184 [1] : vector<8x32xf32> to vector<8xf32>
    %341 = vector.shape_cast %340 : vector<8xf32> to vector<8x1xf32>
    %cst_185 = arith.constant 3.200000e+01 : f32
    %342 = vector.broadcast %cst_185 : f32 to vector<8x1xf32>
    %343 = arith.divf %341, %342 : vector<8x1xf32>
    %344 = vector.broadcast %343 : vector<8x1xf32> to vector<8x32xf32>
    %345 = arith.subf %337, %344 : vector<8x32xf32>
    %346 = arith.mulf %345, %345 : vector<8x32xf32>
    %cst_186 = arith.constant dense<0.000000e+00> : vector<8xf32>
    %347 = vector.multi_reduction <add>, %346, %cst_186 [1] : vector<8x32xf32> to vector<8xf32>
    %348 = vector.shape_cast %347 : vector<8xf32> to vector<8x1xf32>
    %cst_187 = arith.constant 3.200000e+01 : f32
    %349 = vector.broadcast %cst_187 : f32 to vector<8x1xf32>
    %350 = arith.divf %348, %349 : vector<8x1xf32>
    %351 = vector.broadcast %343 : vector<8x1xf32> to vector<8x32xf32>
    %352 = arith.subf %337, %351 : vector<8x32xf32>
    %cst_188 = arith.constant 9.99999974E-6 : f32
    %353 = vector.broadcast %cst_188 : f32 to vector<8x1xf32>
    %354 = arith.addf %350, %353 : vector<8x1xf32>
    %355 = math.rsqrt %354 : vector<8x1xf32>
    %356 = vector.broadcast %355 : vector<8x1xf32> to vector<8x32xf32>
    %357 = arith.mulf %352, %356 : vector<8x32xf32>
    %358 = vector.broadcast %338 : vector<1x32xf32> to vector<8x32xf32>
    %359 = arith.mulf %357, %358 : vector<8x32xf32>
    %360 = vector.broadcast %339 : vector<1x32xf32> to vector<8x32xf32>
    %361 = arith.addf %359, %360 : vector<8x32xf32>
    %c0_189 = arith.constant 0 : index
    %c0_190 = arith.constant 0 : index
    %c0_191 = arith.constant 0 : index
    %362 = vector.load %arg16[%c0_189, %c0_190, %c0_191] : memref<1x8x32xf32, #tpu.memory_space<vmem>>, vector<1x8x32xf32>
    %363 = vector.shape_cast %362 : vector<1x8x32xf32> to vector<8x32xf32>
    %364 = vector.shape_cast %361 : vector<8x32xf32> to vector<1x8x32xf32>
    tpu.vector_store %arg16[%c0_189, %c0_190, %c0_191], %364 {strides = array<i32>} : memref<1x8x32xf32, #tpu.memory_space<vmem>>, vector<1x8x32xf32>,
    return
  }
  func.func @transform_0(%arg0: i32) -> (i32, i32, i32) {
    %c0_i32 = arith.constant 0 : i32
    %c0_i32_0 = arith.constant 0 : i32
    %c0_i32_1 = arith.constant 0 : i32
    return %arg0, %c0_i32, %c0_i32_0 : i32, i32, i32
  }
  func.func @transform_1(%arg0: i32) -> (i32, i32, i32) {
    %c0_i32 = arith.constant 0 : i32
    %c0_i32_0 = arith.constant 0 : i32
    %c0_i32_1 = arith.constant 0 : i32
    %c0_i32_2 = arith.constant 0 : i32
    return %c0_i32, %c0_i32_0, %c0_i32_1 : i32, i32, i32
  }
  func.func @transform_2(%arg0: i32) -> (i32, i32, i32) {
    %c0_i32 = arith.constant 0 : i32
    %c0_i32_0 = arith.constant 0 : i32
    %c0_i32_1 = arith.constant 0 : i32
    %c0_i32_2 = arith.constant 0 : i32
    return %c0_i32, %c0_i32_0, %c0_i32_1 : i32, i32, i32
  }
  func.func @transform_3(%arg0: i32) -> (i32, i32, i32) {
    %c0_i32 = arith.constant 0 : i32
    %c0_i32_0 = arith.constant 0 : i32
    %c0_i32_1 = arith.constant 0 : i32
    %c0_i32_2 = arith.constant 0 : i32
    return %c0_i32, %c0_i32_0, %c0_i32_1 : i32, i32, i32
  }
  func.func @transform_4(%arg0: i32) -> (i32, i32, i32) {
    %c0_i32 = arith.constant 0 : i32
    %c0_i32_0 = arith.constant 0 : i32
    %c0_i32_1 = arith.constant 0 : i32
    %c0_i32_2 = arith.constant 0 : i32
    return %c0_i32, %c0_i32_0, %c0_i32_1 : i32, i32, i32
  }
  func.func @transform_5(%arg0: i32) -> (i32, i32, i32) {
    %c0_i32 = arith.constant 0 : i32
    %c0_i32_0 = arith.constant 0 : i32
    %c0_i32_1 = arith.constant 0 : i32
    %c0_i32_2 = arith.constant 0 : i32
    return %c0_i32, %c0_i32_0, %c0_i32_1 : i32, i32, i32
  }
  func.func @transform_6(%arg0: i32) -> (i32, i32, i32) {
    %c0_i32 = arith.constant 0 : i32
    %c0_i32_0 = arith.constant 0 : i32
    %c0_i32_1 = arith.constant 0 : i32
    %c0_i32_2 = arith.constant 0 : i32
    return %c0_i32, %c0_i32_0, %c0_i32_1 : i32, i32, i32
  }
  func.func @transform_7(%arg0: i32) -> (i32, i32, i32) {
    %c0_i32 = arith.constant 0 : i32
    %c0_i32_0 = arith.constant 0 : i32
    %c0_i32_1 = arith.constant 0 : i32
    %c0_i32_2 = arith.constant 0 : i32
    return %c0_i32, %c0_i32_0, %c0_i32_1 : i32, i32, i32
  }
  func.func @transform_8(%arg0: i32) -> (i32, i32, i32) {
    %c0_i32 = arith.constant 0 : i32
    %c0_i32_0 = arith.constant 0 : i32
    %c0_i32_1 = arith.constant 0 : i32
    %c0_i32_2 = arith.constant 0 : i32
    return %c0_i32, %c0_i32_0, %c0_i32_1 : i32, i32, i32
  }
  func.func @transform_9(%arg0: i32) -> (i32, i32, i32) {
    %c0_i32 = arith.constant 0 : i32
    %c0_i32_0 = arith.constant 0 : i32
    %c0_i32_1 = arith.constant 0 : i32
    %c0_i32_2 = arith.constant 0 : i32
    return %c0_i32, %c0_i32_0, %c0_i32_1 : i32, i32, i32
  }
  func.func @transform_10(%arg0: i32) -> (i32, i32, i32) {
    %c0_i32 = arith.constant 0 : i32
    %c0_i32_0 = arith.constant 0 : i32
    %c0_i32_1 = arith.constant 0 : i32
    %c0_i32_2 = arith.constant 0 : i32
    return %c0_i32, %c0_i32_0, %c0_i32_1 : i32, i32, i32
  }
  func.func @transform_11(%arg0: i32) -> (i32, i32, i32) {
    %c0_i32 = arith.constant 0 : i32
    %c0_i32_0 = arith.constant 0 : i32
    %c0_i32_1 = arith.constant 0 : i32
    %c0_i32_2 = arith.constant 0 : i32
    return %c0_i32, %c0_i32_0, %c0_i32_1 : i32, i32, i32
  }
  func.func @transform_12(%arg0: i32) -> (i32, i32, i32) {
    %c0_i32 = arith.constant 0 : i32
    %c0_i32_0 = arith.constant 0 : i32
    %c0_i32_1 = arith.constant 0 : i32
    %c0_i32_2 = arith.constant 0 : i32
    return %c0_i32, %c0_i32_0, %c0_i32_1 : i32, i32, i32
  }
  func.func @transform_13(%arg0: i32) -> (i32, i32) {
    %c0_i32 = arith.constant 0 : i32
    %c0_i32_0 = arith.constant 0 : i32
    %c0_i32_1 = arith.constant 0 : i32
    return %c0_i32, %c0_i32_0 : i32, i32
  }
  func.func @transform_14(%arg0: i32) -> (i32, i32) {
    %c0_i32 = arith.constant 0 : i32
    %c0_i32_0 = arith.constant 0 : i32
    %c0_i32_1 = arith.constant 0 : i32
    return %c0_i32, %c0_i32_0 : i32, i32
  }
  func.func @transform_15(%arg0: i32) -> (i32, i32, i32) {
    %c0_i32 = arith.constant 0 : i32
    %c0_i32_0 = arith.constant 0 : i32
    %c0_i32_1 = arith.constant 0 : i32
    return %arg0, %c0_i32, %c0_i32_0 : i32, i32, i32
  }
  func.func @transform_16(%arg0: i32) -> (i32, i32, i32, i32, i32) {
    %c0_i32 = arith.constant 0 : i32
    %c0_i32_0 = arith.constant 0 : i32
    %c0_i32_1 = arith.constant 0 : i32
    %c0_i32_2 = arith.constant 0 : i32
    %c0_i32_3 = arith.constant 0 : i32
    return %arg0, %c0_i32, %c0_i32_0, %c0_i32_1, %c0_i32_2 : i32, i32, i32, i32, i32
  }
}

</mosaic_0001>

<bundles_post_ra>
// kernel: tpu_custom_call.1
= control target key start
LH: loop header
LB: loop body
LE: loop exit
PB: predicated region body
PF: predicated region fallthrough
CT: control target
= control target key end

     0   :  { %s2945_s0 = inlined_call_operand.hbm [shape: f32[2,8,32], index: 0, kind: input, shape index: {}]   ;;  %s2946_s1 = inlined_call_operand.vmem [shape: f32[2,32,96], index: 1, kind: input, shape index: {}]   ;;  %s2947_s2 = inlined_call_operand.hbm [shape: f32[2,1,96], index: 2, kind: input, shape index: {}]   ;;  %s2948_s3 = inlined_call_operand.vmem [shape: f32[2,32,32], index: 3, kind: input, shape index: {}]   ;;  %s2949_s4 = inlined_call_operand.vmem [shape: f32[2,1,32], index: 4, kind: input, shape index: {}]   ;;  %s2950_s5 = inlined_call_operand.hbm [shape: f32[2,1,32], index: 5, kind: input, shape index: {}]   ;;  %s2951_s6 = inlined_call_operand.vmem [shape: f32[2,1,32], index: 6, kind: input, shape index: {}]   ;;  %s2952_s7 = inlined_call_operand.vmem [shape: f32[2,32,64], index: 7, kind: input, shape index: {}]   ;;  %s2953_s8 = inlined_call_operand.hbm [shape: f32[2,1,64], index: 8, kind: input, shape index: {}]   ;;  %s2954_s9 = inlined_call_operand.vmem [shape: f32[2,64,32], index: 9, kind: input, shape index: {}]   ;;  %s2955_s10 = inlined_call_operand.vmem [shape: f32[2,1,32], index: 10, kind: input, shape index: {}]   ;;  %s2956_s11 = inlined_call_operand.vmem [shape: f32[2,1,32], index: 11, kind: input, shape index: {}]   ;;  %s2957_s12 = inlined_call_operand.vmem [shape: f32[2,1,32], index: 12, kind: input, shape index: {}]   ;;  %s2958_s13 = inlined_call_operand.vmem [shape: f32[1,32], index: 13, kind: input, shape index: {}]   ;;  %s2959_s14 = inlined_call_operand.hbm [shape: f32[1,32], index: 14, kind: input, shape index: {}]   ;;  %s2960_s15 = inlined_call_operand.hbm [shape: f32[2,8,32], index: 15, kind: output, shape index: {0}]   ;;  %s2961_s16 = inlined_call_operand.hbm [shape: f32[2,2,4,8,8], index: 16, kind: output, shape index: {1}]  }
   0x1   :  { %2981 = sst [smem:[#allocation24_spill]] %s2945_s0 }
   0x2   :  { %2982 = sst [smem:[#allocation25_spill]] %s2946_s1 }
   0x3   :  { %2983 = sst [smem:[#allocation26_spill]] %s2947_s2 }
   0x4   :  { %2984 = sst [smem:[#allocation27_spill]] %s2950_s5 }
   0x5   :  { %2985 = sst [smem:[#allocation28_spill]] %s2953_s8 }
   0x6   :  { %2986 = sst [smem:[#allocation29_spill]] %s2958_s13 }
   0x7   :  { %2987 = sst [smem:[#allocation30_spill]] %s2959_s14 }
   0x8   :  { %2988 = sst [smem:[#allocation31_spill]] %s2960_s15 }
   0x9   :  { %22 = vsyncpa [#allocation3], 0 }
   0xa   :  { %24 = vsyncpa [#allocation3 + $0x1], 0 }
   0xb   :  { %25 = vsyncpa [#allocation6], 0 }
   0xc   :  { %26 = vsyncpa [#allocation9], 0 }
   0xd   :  { %27 = vsyncpa [#allocation4], 0 }
   0xe   :  { %29 = vsyncpa [#allocation4 + $0x1], 0 }
   0xf   :  { %30 = vsyncpa [#allocation13], 0 }
  0x10   :  { %32 = vsyncpa [#allocation13 + $0x1], 0  ;;  %s2438_s21 = smov 0   ;;  %s2440_s22 = smov 0  }
  0x11   :  { %s2442_s23 = smov 0   ;;  %s2444_s24 = smov 0  }
  0x12 LB: > { %2989 = sst [smem:[#allocation19_spill]] %s2317_s21  ;;  %s2462_s28 = sadd.s32 4294967295, %s2329_s24   ;;  %s2329_s24 = sphi %s2444_s24, %s3023_s24   ;;  %s2325_s23 = sphi %s2442_s23, %s3025_s23   ;;  %s2321_s22 = sphi %s2440_s22, %s3027_s22   ;;  %s2317_s21 = sphi %s2438_s21, %s3026_s21  }
  0x13   : > { %2990 = sst [smem:[#allocation20_spill]] %s2325_s23  ;;  %p1813_p0 = scmp.ge.s32.totalorder %s2329_s24, 1 }
  0x14   : > { %s2991_s2 = sld [smem:[#allocation26_spill]]  ;;  %p59_p1 = scmp.eq.s32.totalorder %s2462_s28, 0 }
  0x15   : > { %p415_p2 = scmp.lt.s32.totalorder %s2329_s24, 3  ;;  %s2331_s30 = smov [#allocation5]  }
  0x16   : > { %s431_s0 = sshll.u32 %s2331_s30, 4  ;;  %s2993_s8 = sld [smem:[#allocation28_spill]]  ;;  %s432_s0 = int_to_ptr.vmem [resolvable:$true] %s431_s0 }
  0x17   : > { %p2467_p3 = pnand %p1813_p0, %p415_p2  ;;  %s2995_s5 = sld [smem:[#allocation27_spill]] }
  0x18   : > { %s2333_s13 = smov 16   ;;  %s2334_s17 = smov 1  }
  0x19   : > { %p1923_p4 = pneg %p2467_p3  ;;  %s2996_s14 = sld [smem:[#allocation30_spill]] }
  0x1a   : > { %s429_s27 = sshll.u32 %s2991_s2, 4  ;;  %s2332_s2 = smov [#allocation8]   ;;  %s430_s27 = int_to_ptr.hbm [resolvable:$true] %s429_s27 }
  0x1b   : > { %p2479_p6 = pnand %p1923_p4, %p59_p1  ;;  %s471_s15 = sshll.u32 %s2332_s2, 4  ;;  %s472_s15 = int_to_ptr.vmem [resolvable:$true] %s471_s15 }
  0x1c   : > { %s469_s19 = sshll.u32 %s2993_s8, 4  ;;  %s2335_s2 = smov [#allocation7]   ;;  %s470_s19 = int_to_ptr.hbm [resolvable:$true] %s469_s19 }
  0x1d   : > { %s449_s30 = sshll.u32 %s2995_s5, 4  ;;  %s451_s26 = sshll.u32 %s2335_s2, 4  ;;  %s450_s30 = int_to_ptr.hbm [resolvable:$true] %s449_s30  ;;  %s452_s26 = int_to_ptr.vmem [resolvable:$true] %s451_s26 }
  0x1e   : > { %1926 = dma.hbm_to_vmem [thread:$0]  (!%p2479_p6), %s430_s27, 32, %s432_s0, [#allocation6], %s2333_s13, %s2333_s13, %s2334_s17  }
  0x1f   : > { %1932 = dma.hbm_to_vmem [thread:$0]  (!%p2479_p6), %s470_s19, 32, %s472_s15, [#allocation9], %s2333_s13, %s2333_s13, %s2334_s17  }
  0x20   : > { %s499_s25 = sshll.u32 %s2996_s14, 4  ;;  %s2336_s27 = smov [#allocation10]   ;;  %s500_s25 = int_to_ptr.hbm [resolvable:$true] %s499_s25 }
  0x21   : > { %1929 = dma.hbm_to_vmem [thread:$0]  (!%p2479_p6), %s450_s30, 32, %s452_s26, [#allocation6], %s2333_s13, %s2333_s13, %s2334_s17  }
  0x22   : > { %s501_s15 = sshll.u32 %s2336_s27, 4  ;;  %s1812_s8 = sadd.s32 4294967294, %s2329_s24   ;;  %s502_s15 = int_to_ptr.vmem [resolvable:$true] %s501_s15 }
  0x23   : > { %1935 = dma.hbm_to_vmem [thread:$0]  (!%p2479_p6), %s500_s25, 16, %s502_s15, [#allocation9]  }
  0x24   : > { %s2499_s0 = sadd.s32 1, %s2329_s24   ;;  %s45_s18 = sadd.s32 1, %s2325_s23 }
  0x25   : > { %2997 = sst [smem:[#allocation21_spill]] %s2499_s0  ;;  %s42_s19 = ssub.s32 %s2329_s24, %s2499_s0 }
  0x26   : > { %p43_p7 = scmp.eq.s32.totalorder %s42_s19, 0  ;;  %p52_p8 = scmp.ne.s32.totalorder %s2325_s23, %s2321_s22 }
  0x27   : > { %p53_p9 = scmp.eq.s32.totalorder %s2329_s24, 0  ;;  %p58_p10 = scmp.ne.s32.totalorder %s2321_s22, %s2317_s21 }
  0x28   : > { %s2510_s13 = scalar_select %p43_p7, %s2325_s23, %s45_s18  }
  0x29   : > { %p2512_p11 = por %p53_p9, %p52_p8  ;;  %p2518_p12 = por %p59_p1, %p58_p10 }
  0x2a   : > { %2998 = sst [smem:[#allocation22_spill]] %s2510_s13  ;;  %p376_p13 = scmp.eq.s32.totalorder %s2462_s28, 1 }
  0x2b   : > { %p382_p0 = scmp.eq.s32.totalorder %s1812_s8, 1  ;;  %p1951_p2 = scmp.lt.s32.totalorder %s2329_s24, 2 }
  0x2c   : > { %s512_s17 = sand.u32 1, %s2325_s23   ;;  %p2525_p4 = por %p376_p13, %p52_p8 }
  0x2d   : > { %p2529_p6 = por %p382_p0, %p58_p10  ;;  %s1819_s26 = sshll.u32 %s512_s17, 3 }
  0x2e   : > { %s1820_s27 = sshll.u32 %s2329_s24, 3  ;;  %s3004_s18 = sld [smem:[#allocation24_spill]] }
  0x2f   : > { %s3002_s2 = scalar_select %p2529_p6, 1, 0 }
  0x30   : > { %s516_s14 = scalar_lea.vmem [#allocation2], %s1819_s26  ;;  %p2539_p7 = pnand %p1951_p2, %p2512_p11 }
  0x31   : > { %3003 = sst [smem:[#allocation23_spill]] %s3002_s2  ;;  %s524_s13 = sshll.u32 %s516_s14, 4  ;;  %s525_s13 = int_to_ptr.vmem [resolvable:$true] %s524_s13 }
  0x32   : > { %s513_s23 = scalar_lea.sflag [#allocation3], %s512_s17  ;;  %p2197_p9 = pneg %p2539_p7 }
  0x34   : > { %s520_s5 = scalar_lea.hbm %s3004_s18, %s1820_s27 }
  0x35   : > { %s522_s0 = sshll.u32 %s520_s5, 4  ;;  %s2200_s5 = scalar_lea.hbm %s3004_s18, 16  ;;  %s523_s0 = int_to_ptr.hbm [resolvable:$true] %s522_s0 }
  0x36   : > { %s2193_s21 = sshra.s32 %s523_s0, 4  ;;  %s2194_s21 = int_to_ptr.hbm [resolvable:$true] %s2193_s21 }
  0x37   : > { %s2195_s2 = scalar_lea.hbm %s2194_s21, 8  ;;  %p2201_p11 = scmp.lt.s32.totalorder %s2194_s21, %s3004_s18 }
  0x38   : > { %p2196_p8 = scmp.ne.s32.totalorder %s2194_s21, %s2195_s2  ;;  %p2202_p0 = scmp.lt.s32.totalorder %s2200_s5, %s2195_s2 }
  0x3a   : > { %p2198_p10 = pnand %p2197_p9, %p2196_p8  ;;  %p2203_p2 = por %p2202_p0, %p2201_p11 }
  0x3c   : > { %p2199_p13 = pneg %p2198_p10 }
  0x3e   : > { %p2204_p5 = pnand %p2203_p2, %p2199_p13 }
  0x40   : > { %2207 = shalt.err (!%p2204_p5)
}
  0x41   : > { %1939 = dma.hbm_to_vmem [thread:$0]  (!%p2539_p7), %s523_s0, 128, %s525_s13, %s513_s23  }
  0x42   : > { %533 = sbr.rel (%p2467_p3) target bundleno = 4786 (0x12b2), region = 80  ;;  %s2556_s17 = sand.u32 (!%p2467_p3), 1, %s2321_s22  }
  0x43   : > { %s2969_s15 = sshll.u32 (!%p2467_p3), %s2556_s17, 3  ;;  %s536_s19 = scalar_lea.sflag (!%p2467_p3), [#allocation3], %s2556_s17 }
  0x44   : > { %s539_s21 = scalar_lea.vmem (!%p2467_p3), [#allocation2], %s2969_s15 }
  0x47   : > { %2296 = dma.done.wait (%p2518_p12), %s536_s19, 128  }
  0x48   : > { %2298 = vsyncadd (%p2518_p12), %s536_s19, 4294967168 }
  0x49   : > { %2300 = dma.done.wait (%p59_p1), [#allocation6], 64  }
  0x4a   : > { %2302 = vsyncadd (%p59_p1), [#allocation6], 4294967232 }
  0x4b   : > { %2304 = dma.done.wait (%p59_p1), [#allocation9], 48  }
  0x4c   : > { %2306 = vsyncadd (%p59_p1), [#allocation9], 4294967248  ;;  %s3006_s1 = sld [smem:[#allocation25_spill]]  ;;  %vm623_vm0 = vcmask 261120   ;;  %v2586_v4 = vld [vmem:[%s539_s21] sm:$0xff]  ;;  %s2975_s14 = smov 88  }
  0x4d   : > { %v2011_v5 = vld [vmem:[#allocation5] ss:$0 sm:$0xff]  ;;  %s2338_s5 = smov 64   ;;  %s2339_s27 = smov 96   ;;  %vm650_vm1 = vcmask 64512   ;;  %vm931_vm2 = vcmask 130048  }
  0x4e   : > { %s2340_s30 = smov 120   ;;  %s2341_s19 = smov 80   ;;  %vm933_vm3 = vcmask 195584   ;;  %vm1050_vm8 = vcmask 523264  }
  0x4f   : > { %s2973_s21 = smov 72   ;;  %s2974_s23 = smov 112  }
  0x50   : > { %s2980_s29 = smov 104   ;;  %s2970_s0 = smov 40  }
  0x51   : > { %s1828_s13 = sshll.u32 %s2556_s17, 6  ;;  %s2972_s2 = smov 56  }
  0x52   : > { %v618_v0 = vld [vmem:[%s3006_s1 + $0x18] sm:$0xff]  ;;  %v617_v1 = vld [vmem:[%s3006_s1 + $0x10] sm:$0xff]  ;;  %v616_v2 = vld [vmem:[%s3006_s1 + $0x8] sm:$0xff]  ;;  %s2621_s20 = scalar_lea.vmem [#allocation12], %s1828_s13  ;;  %s2971_s8 = smov 48  }
  0x53   : > { %639 = vmatpush.msra.mxu0 %v618_v0  ;;  %v615_v3 = vld [vmem:[%s3006_s1] sm:$0xff]  ;;  %s2977_s26 = smov 8   ;;  %s2976_s13 = smov 24  }
  0x54   : > { %s2979_s15 = smov 16  }
  0x55   : > { %640 = vmatpush.msra.mxu0 %v617_v1 }
  0x57   : > { %641 = vmatpush.msra.mxu0 %v616_v2 }
  0x59   : > { %642 = vmatpush.msra.mxu0 %v615_v3  ;;  %v938_v3 = vld [vmem:[%s2948_s3 + $0x18] sm:$0xff] }
  0x5a   : > { %1829 = vmatmul.msk.f32.vlgmr.msra.gmra.mxu0 %vm623_vm0, %v2586_v4 }
  0xd7   : > { %v644_v6 = vpop.f32.mrf.mxu0 }
  0xd8   : > { %v2590_v7 = vadd.f32 %v2011_v5, %v644_v6  ;;  %v937_v5 = vld [vmem:[%s2948_s3 + $0x10] sm:$0xff]  ;;  %v936_v6 = vld [vmem:[%s2948_s3 + $0x8] sm:$0xff] }
  0xda   : > { %716 = vrot.lane.b32.xlu2 %v2590_v7, %s2975_s14  ;;  %688 = vrot.lane.b32.xlu1 %v2590_v7, %s2338_s5 }
  0xdb   : > { %648 = vrot.lane.b32.xlu0 %v2590_v7, %s2339_s27 }
  0xe2   : > { %714 = vrot.lane.b32.xlu2 %v2590_v7, %s2340_s30 }
  0xea   : > { %784 = vrot.lane.b32.xlu2 %v2590_v7, %s2341_s19 }
  0xf2   : > { %852 = vrot.lane.b32.xlu2 %v2590_v7, %s2973_s21  ;;  %s1900_s21 = sshll.u32 %s2462_s28, 6 }
  0xfa   : > { %782 = vrot.lane.b32.xlu2 %v2590_v7, %s2974_s23  ;;  %s3007_s23 = smov 104  }
 0x134   : > { %v717_v8 = vpop.permute.xlu2 %716 }
 0x13c   : > { %v715_v9 = vpop.permute.xlu2 %714 }
 0x144   : > { %v785_v10 = vpop.permute.xlu2 %784 }
 0x14c   : > { %v853_v11 = vpop.permute.xlu2 %852  ;;  %v689_v12 = vpop.permute.xlu1 %688 }
 0x14d   : > { %v649_v13 = vpop.permute.xlu0 %648  ;;  %709 = vmatpush.msra.mxu3 %v689_v12  ;;  %1841 = vmatpush.xpose.msk.msrb.mxu0 %vm650_vm1, %v853_v11 }
 0x14e   : > { %1830 = vmatpush.xpose.msk.msra.mxu1 %vm650_vm1, %v649_v13 }
 0x14f   : > { %1833 = vmatpush.xpose.msk.msrb.mxu3 %vm650_vm1, %v717_v8 }
 0x151   : > { %1831 = vmatmul.msk.f32.vlgmr.msra.gmra.mxu1 %vm650_vm1, %v2590_v7 }
 0x152   : > { %1837 = vmatpush.xpose.msk.msrb.mxu1 %vm650_vm1, %v785_v10 }
 0x154   : > { %v783_v14 = vpop.permute.xlu2 %782 }
 0x156   : > { %958 = vmatpush.msra.mxu1 %v938_v3 }
 0x158   : > { %959 = vmatpush.msra.mxu1 %v937_v5 }
 0x159   : > { %1838 = vmatmul.msk.f32.vlgmr.msrb.gmra.mxu1 %vm650_vm1, %v783_v14  ;;  %v2012_v14 = vld [vmem:[%s2949_s4] ss:$0 sm:$0xff] }
 0x15a   : > { %960 = vmatpush.msra.mxu1 %v936_v6 }
 0x1ce   : > { %v672_v15 = vpop.f32.mrf.mxu1 }
 0x1cf   : > { %v675_v16 = vmul.f32 0.35355338, %v672_v15 }
 0x1d1   : > { %v676_v17 = vsel %vm650_vm1, %v675_v16, -inf }
 0x1d2   : > { %677 = vmax.xlane.f32.xlu0 %v676_v17 }
 0x1d6   : > { %v807_v23 = vpop.f32.mrf.mxu1 }
 0x1d7   : > { %v810_v24 = vmul.f32 0.35355338, %v807_v23 }
 0x1d9   : > { %v811_v25 = vsel %vm650_vm1, %v810_v24, -inf }
 0x245   : > { %v678_v18 = vpop.xlane.xlu0 %677 }
 0x246   : > { %v679_v19 = vsub.f32 %v675_v16, %v678_v18 }
 0x248   : > { %v680_v20 = vmul.f32 1.442695, %v679_v19  ;;  %v2351_v19 = vmov 32.0  }
 0x24a   : > { %2029 = vpow2.f32 %v680_v20 }
 0x250   : > { %v2030_v21 = vpop.eup %2029 }
 0x251   : > { %v682_v22 = vsel %vm650_vm1, %v2030_v21, 0.0 }
 0x252   : > { %683 = vadd.xlane.f32.xlu1 %v682_v22 }
 0x26b   : > { %850 = vrot.lane.b32.xlu1 %v2590_v7, %s2980_s29  ;;  %s2243_s29 = scalar_lea.hbm %s2961_s16, 128 }
 0x295   : > { %812 = vmax.xlane.f32.xlu1 %v811_v25 }
 0x2ae   : > { %892 = vrot.lane.b32.xlu1 %v2590_v7, %s2970_s0  ;;  %s3012_s0 = smov 48  }
 0x2c5   : > { %v684_v26 = vpop.xlane.xlu1 %683 }
 0x2c6   : > { %2031 = vrcp.f32 %v684_v26 }
 0x2cc   : > { %v2032_v27 = vpop.eup %2031 }
 0x2cd   : > { %v686_v28 = vmul.f32 %v2032_v27, %v2030_v21 }
 0x2cf   : > { %687 = vst.msk [vmem:[%s2621_s20] sm:$0xff] %vm650_vm1, %v686_v28  ;;  %1832 = vmatmul.msk.f32.vlgmr.msra.gmra.mxu3 %vm650_vm1, %v686_v28 }
 0x2d7   : > { %1834 = vmatmul.msk.f32.vlgmr.msrb.gmra.mxu3 %vm650_vm1, %v715_v9 }
 0x2dd   : > { %v851_v29 = vpop.permute.xlu1 %850 }
 0x2de   : > { %1842 = vmatmul.msk.f32.vlgmr.msrb.gmra.mxu0 %vm650_vm1, %v851_v29 }
 0x308   : > { %v813_v30 = vpop.xlane.xlu1 %812 }
 0x309   : > { %v814_v32 = vsub.f32 %v810_v24, %v813_v30  ;;  %v1009_v30 = vld [vmem:[%s2952_s7 + $0x18] sm:$0xff] }
 0x30b   : > { %v815_v33 = vmul.f32 1.442695, %v814_v32  ;;  %v1007_v32 = vld [vmem:[%s2952_s7 + $0x8] sm:$0xff] }
 0x30d   : > { %2033 = vpow2.f32 %v815_v33  ;;  %v1006_v33 = vld [vmem:[%s2952_s7] sm:$0xff] }
 0x313   : > { %v2034_v40 = vpop.eup %2033 }
 0x314   : > { %v817_v41 = vsel %vm650_vm1, %v2034_v40, 0.0 }
 0x320   : > { %v893_v49 = vpop.permute.xlu1 %892 }
 0x352   : > { %v2628_v31 = vpop.f32.mrf.mxu3 }
 0x35a   : > { %v739_v34 = vpop.f32.mrf.mxu3 }
 0x35b   : > { %v742_v35 = vmul.f32 0.35355338, %v739_v34  ;;  %v875_v36 = vpop.f32.mrf.mxu0  ;;  %v1045_v34 = vld [vmem:[%s2954_s9 + $0x38] sm:$0xff] }
 0x35c   : > { %v878_v37 = vmul.f32 0.35355338, %v875_v36  ;;  %1062 = vmatpush.msra.mxu0 %v1045_v34  ;;  %v1043_v36 = vld [vmem:[%s2954_s9 + $0x28] sm:$0xff] }
 0x35d   : > { %v743_v38 = vsel %vm650_vm1, %v742_v35, -inf }
 0x35e   : > { %744 = vmax.xlane.f32.xlu2 %v743_v38  ;;  %v879_v39 = vsel %vm650_vm1, %v878_v37, -inf }
 0x35f   : > { %880 = vmax.xlane.f32.xlu0 %v879_v39  ;;  %v1042_v39 = vld [vmem:[%s2954_s9 + $0x20] sm:$0xff] }
 0x367   : > { %818 = vadd.xlane.f32.xlu0 %v817_v41  ;;  %v1041_v41 = vld [vmem:[%s2954_s9 + $0x18] sm:$0xff] }
 0x376   : > { %756 = vrot.lane.b32.xlu2 %v2590_v7, %s2972_s2  ;;  %s3013_s2 = smov 40  }
 0x3d1   : > { %v745_v42 = vpop.xlane.xlu2 %744 }
 0x3d2   : > { %v881_v43 = vpop.xlane.xlu0 %880  ;;  %v746_v45 = vsub.f32 %v742_v35, %v745_v42  ;;  %v1044_v35 = vld [vmem:[%s2954_s9 + $0x30] sm:$0xff] }
 0x3d3   : > { %v882_v44 = vsub.f32 %v878_v37, %v881_v43  ;;  %1063 = vmatpush.msra.mxu0 %v1044_v35 }
 0x3d4   : > { %v747_v47 = vmul.f32 1.442695, %v746_v45 }
 0x3d5   : > { %v883_v46 = vmul.f32 1.442695, %v882_v44  ;;  %1064 = vmatpush.msra.mxu0 %v1043_v36 }
 0x3d7   : > { %2035 = vpow2.f32 %v883_v46  ;;  %1065 = vmatpush.msra.mxu0 %v1042_v39 }
 0x3d9   : > { %v757_v48 = vpop.permute.xlu2 %756  ;;  %1066 = vmatpush.msra.mxu0 %v1041_v41 }
 0x3da   : > { %777 = vmatpush.msra.mxu2 %v757_v48  ;;  %v819_v50 = vpop.xlane.xlu0 %818  ;;  %v2013_v48 = vld [vmem:[#allocation7] ss:$0 sm:$0xff] }
 0x3db   : > { %2037 = vrcp.f32 %v819_v50 }
 0x3dc   : > { %913 = vmatpush.msrb.mxu2 %v893_v49  ;;  %2039 = vpow2.f32 %v747_v47 }
 0x3dd   : > { %v2036_v51 = vpop.eup %2035 }
 0x3de   : > { %v885_v52 = vsel %vm650_vm1, %v2036_v51, 0.0 }
 0x3df   : > { %886 = vadd.xlane.f32.xlu0 %v885_v52 }
 0x3e1   : > { %v2038_v53 = vpop.eup %2037 }
 0x3e2   : > { %v821_v54 = vmul.f32 %v2038_v53, %v2034_v40  ;;  %v2040_v55 = vpop.eup %2039 }
 0x3e3   : > { %v749_v56 = vsel %vm650_vm1, %v2040_v55, 0.0 }
 0x3e4   : > { %1839 = vst.msk [vmem:[%s2621_s20 + $0x10] sm:$0xff] %vm650_vm1, %v821_v54 }
 0x3e7   : > { %750 = vadd.xlane.f32.xlu0 %v749_v56  ;;  %v1038_v56 = vld [vmem:[%s2954_s9] sm:$0xff] }
 0x3fb   : > { %824 = vrot.lane.b32.xlu0 %v2590_v7, %s2971_s8  ;;  %v935_v7 = vld [vmem:[%s2948_s3] sm:$0xff]  ;;  %s3014_s8 = smov 8  }
 0x3fc   : > { %961 = vmatpush.msra.mxu1 %v935_v7 }
 0x452   : > { %v887_v57 = vpop.xlane.xlu0 %886 }
 0x453   : > { %2041 = vrcp.f32 %v887_v57  ;;  %v2015_v57 = vld [vmem:[#allocation8] ss:$0 sm:$0xff] }
 0x459   : > { %v2042_v58 = vpop.eup %2041 }
 0x45a   : > { %v751_v59 = vpop.xlane.xlu0 %750  ;;  %v889_v60 = vmul.f32 %v2042_v58, %v2036_v51  ;;  %v2014_v51 = vld [vmem:[%s2951_s6] ss:$0 sm:$0xff] }
 0x45b   : > { %2043 = vrcp.f32 %v751_v59 }
 0x45c   : > { %1843 = vst.msk [vmem:[%s2621_s20 + $0x18] sm:$0xff] %vm650_vm1, %v889_v60  ;;  %2045 = vrcp.f32 %v2351_v19 }
 0x461   : > { %v2044_v61 = vpop.eup %2043 }
 0x462   : > { %v753_v62 = vmul.f32 %v2044_v61, %v2040_v55  ;;  %v2046_v20 = vpop.eup %2045  ;;  %v1039_v55 = vld [vmem:[%s2954_s9 + $0x8] sm:$0xff]  ;;  %v2016_v61 = vld [vmem:[%s2955_s10] ss:$0 sm:$0xff] }
 0x463   : > { %v973_v21 = vmul.f32 32.0, %v2046_v20  ;;  %vm977_vm4 = vweird.f32 %v2046_v20 }
 0x464   : > { %1835 = vst.msk [vmem:[%s2621_s20 + $0x8] sm:$0xff] %vm650_vm1, %v753_v62  ;;  %1836 = vmatmul.msk.f32.vlgmr.msra.gmra.mxu2 %vm650_vm1, %v753_v62 }
 0x465   : > { %v974_v22 = vsub.f32 1.0, %v973_v21  ;;  %v2017_v21 = vld [vmem:[%s2956_s11] ss:$0 sm:$0xff] }
 0x467   : > { %v975_v23 = vmul.f32 %v2046_v20, %v974_v22 }
 0x469   : > { %v976_v24 = vadd.f32 %v2046_v20, %v975_v23 }
 0x46b   : > { %v2673_v25 = vsel %vm977_vm4, %v2046_v20, %v976_v24  ;;  %v2018_v24 = vld [vmem:[%s2957_s12] ss:$0 sm:$0xff] }
 0x46c   : > { %1844 = vmatmul.msk.f32.vlgmr.msrb.gmra.mxu2 %vm650_vm1, %v889_v60 }
 0x46d   : > { %v825_v63 = vpop.permute.xlu0 %824 }
 0x46e   : > { %845 = vmatpush.msra.mxu3 %v825_v63 }
 0x46f   : > { %1840 = vmatmul.msk.f32.vlgmr.msra.gmra.mxu3 %vm650_vm1, %v821_v54  ;;  %v1040_v54 = vld [vmem:[%s2954_s9 + $0x10] sm:$0xff] }
 0x470   : > { %1029 = vmatpush.msrb.mxu3 %v1009_v30  ;;  %1067 = vmatpush.msra.mxu0 %v1040_v54 }
 0x472   : > { %1068 = vmatpush.msra.mxu0 %v1039_v55 }
 0x474   : > { %1069 = vmatpush.msra.mxu0 %v1038_v56 }
 0x4e7   : > { %v779_v0 = vpop.f32.mrf.mxu2 }
 0x4e8   : > { %919 = vrot.lane.b32.xlu0 %v779_v0, %s2977_s26  ;;  %s3015_s26 = smov 24  }
 0x4ef   : > { %v915_v1 = vpop.f32.mrf.mxu2 }
 0x4f0   : > { %927 = vrot.lane.b32.xlu1 %v915_v1, %s2976_s13  ;;  %s3016_s13 = smov 16  }
 0x4f2   : > { %v847_v2 = vpop.f32.mrf.mxu3 }
 0x4f3   : > { %923 = vrot.lane.b32.xlu2 %v847_v2, %s2979_s15 }
 0x54d   : > { %v924_v10 = vpop.permute.xlu2 %923 }
 0x55a   : > { %v920_v8 = vpop.permute.xlu0 %919 }
 0x55b   : > { %v930_v9 = vsel %vm650_vm1, %v2628_v31, %v920_v8  ;;  %v1008_v31 = vld [vmem:[%s2952_s7 + $0x10] sm:$0xff]  ;;  %v1851_v8 = vld [vmem:[%s3006_s1 + $0x38] sm:$0xff] }
 0x55c   : > { %v932_v11 = vsel %vm931_vm2, %v930_v9, %v924_v10  ;;  %1030 = vmatpush.msrb.mxu3 %v1008_v31  ;;  %1132 = vmatpush.msra.mxu2 %v1851_v8  ;;  %v1850_v9 = vld [vmem:[%s3006_s1 + $0x30] sm:$0xff]  ;;  %v1849_v10 = vld [vmem:[%s3006_s1 + $0x28] sm:$0xff] }
 0x55e   : > { %1031 = vmatpush.msrb.mxu3 %v1007_v32  ;;  %1133 = vmatpush.msra.mxu2 %v1850_v9 }
 0x560   : > { %1032 = vmatpush.msrb.mxu3 %v1006_v33  ;;  %1134 = vmatpush.msra.mxu2 %v1849_v10 }
 0x562   : > { %v928_v12 = vpop.permute.xlu1 %927 }
 0x563   : > { %v934_v13 = vsel %vm933_vm3, %v932_v11, %v928_v12  ;;  %v1848_v11 = vld [vmem:[%s3006_s1 + $0x20] sm:$0xff] }
 0x564   : > { %1845 = vmatmul.msk.f32.vlgmr.msra.gmra.mxu1 %vm623_vm0, %v934_v13  ;;  %1135 = vmatpush.msra.mxu2 %v1848_v11 }
 0x5e1   : > { %v963_v15 = vpop.f32.mrf.mxu1 }
 0x5e2   : > { %v964_v16 = vadd.f32 %v2012_v14, %v963_v15 }
 0x5e4   : > { %v966_v17 = vadd.f32 %v964_v16, %v2586_v4 }
 0x5e6   : > { %v969_v18 = vsel %vm623_vm0, %v966_v17, 0.0 }
 0x5e7   : > { %970 = vadd.xlane.f32.xlu0 %v969_v18 }
 0x65a   : > { %v971_v26 = vpop.xlane.xlu0 %970 }
 0x65b   : > { %v979_v27 = vmul.f32 %v2673_v25, %v971_v26 }
 0x65d   : > { %v980_v28 = vsub.f32 %v966_v17, %v979_v27 }
 0x65f   : > { %v981_v29 = vmul.f32 %v980_v28, %v980_v28 }
 0x661   : > { %v982_v4 = vsel %vm623_vm0, %v981_v29, 0.0 }
 0x662   : > { %983 = vadd.xlane.f32.xlu2 %v982_v4 }
 0x6d5   : > { %v984_v37 = vpop.xlane.xlu2 %983 }
 0x6d6   : > { %v985_v38 = vmul.f32 %v984_v37, %v2673_v25 }
 0x6d8   : > { %v986_v40 = vadd.f32 1e-05, %v985_v38 }
 0x6da   : > { %2047 = vrsqrt.f32 %v986_v40  ;;  %vm993_vm6 = vweird.f32 %v986_v40 }
 0x6e0   : > { %v2048_v42 = vpop.eup %2047 }
 0x6e1   : > { %v988_v43 = vmul.f32 %v2048_v42, %v986_v40  ;;  %vm994_vm5 = vweird.f32 %v2048_v42 }
 0x6e2   : > { %vm995_vm7 = vmor %vm993_vm6, %vm994_vm5 }
 0x6e3   : > { %v989_v44 = vmul.f32 %v2048_v42, %v988_v43 }
 0x6e5   : > { %v990_v45 = vmul.f32 0.5, %v989_v44 }
 0x6e7   : > { %v991_v46 = vsub.f32 1.5, %v990_v45 }
 0x6e9   : > { %v992_v47 = vmul.f32 %v2048_v42, %v991_v46 }
 0x6eb   : > { %v996_v49 = vsel %vm995_vm7, %v2048_v42, %v992_v47 }
 0x6ec   : > { %v997_v50 = vmul.f32 %v996_v49, %v980_v28  ;;  %v2019_v28 = vld [vmem:[#allocation5 + $0x1] ss:$0 sm:$0xff] }
 0x6ee   : > { %v1001_v52 = vmul.f32 %v2013_v48, %v997_v50 }
 0x6f0   : > { %v1005_v53 = vadd.f32 %v2014_v51, %v1001_v52 }
 0x6f2   : > { %1846 = vmatmul.msk.f32.vlgmr.msrb.gmra.mxu3 %vm623_vm0, %v1005_v53 }
 0x775   : > { %v1034_v58 = vpop.f32.mrf.mxu3 }
 0x776   : > { %v1035_v59 = vadd.f32 %v2015_v57, %v1034_v58 }
 0x778   : > { %v1037_v60 = vmax.f32 %v1035_v59, 0.0 }
 0x77a   : > { %1847 = vmatmul.msk.f32.vlgmr.msra.gmra.mxu0 %vm1050_vm8, %v1037_v60 }
 0x7f7   : > { %v1071_v62 = vpop.f32.mrf.mxu0 }
 0x7f8   : > { %v1072_v63 = vadd.f32 %v2016_v61, %v1071_v62 }
 0x7fa   : > { %v1074_v0 = vadd.f32 %v1072_v63, %v1005_v53 }
 0x7fc   : > { %v1077_v1 = vsel %vm623_vm0, %v1074_v0, 0.0 }
 0x7fd   : > { %1078 = vadd.xlane.f32.xlu1 %v1077_v1 }
 0x870   : > { %v1079_v2 = vpop.xlane.xlu1 %1078 }
 0x871   : > { %v1080_v3 = vmul.f32 %v1079_v2, %v2673_v25 }
 0x873   : > { %v1081_v5 = vsub.f32 %v1074_v0, %v1080_v3 }
 0x875   : > { %v1082_v6 = vmul.f32 %v1081_v5, %v1081_v5 }
 0x877   : > { %v1083_v7 = vsel %vm623_vm0, %v1082_v6, 0.0 }
 0x878   : > { %1084 = vadd.xlane.f32.xlu0 %v1083_v7 }
 0x8eb   : > { %v1085_v12 = vpop.xlane.xlu0 %1084 }
 0x8ec   : > { %v1086_v13 = vmul.f32 %v1085_v12, %v2673_v25 }
 0x8ee   : > { %v1087_v14 = vadd.f32 1e-05, %v1086_v13 }
 0x8f0   : > { %2049 = vrsqrt.f32 %v1087_v14  ;;  %vm1094_vm10 = vweird.f32 %v1087_v14 }
 0x8f6   : > { %v2050_v15 = vpop.eup %2049 }
 0x8f7   : > { %v1089_v16 = vmul.f32 %v2050_v15, %v1087_v14  ;;  %vm1095_vm9 = vweird.f32 %v2050_v15 }
 0x8f8   : > { %vm1096_vm11 = vmor %vm1094_vm10, %vm1095_vm9 }
 0x8f9   : > { %v1090_v17 = vmul.f32 %v2050_v15, %v1089_v16 }
 0x8fb   : > { %v1091_v18 = vmul.f32 0.5, %v1090_v17 }
 0x8fd   : > { %v1092_v19 = vsub.f32 1.5, %v1091_v18 }
 0x8ff   : > { %v1093_v20 = vmul.f32 %v2050_v15, %v1092_v19 }
 0x901   : > { %v1097_v22 = vsel %vm1096_vm11, %v2050_v15, %v1093_v20 }
 0x902   : > { %v1098_v23 = vmul.f32 %v1097_v22, %v1081_v5 }
 0x904   : > { %v1102_v26 = vmul.f32 %v2017_v21, %v1098_v23 }
 0x906   : > { %v2744_v27 = vadd.f32 %v2018_v24, %v1102_v26 }
 0x908   : > { %1852 = vmatmul.msk.f32.vlgmr.msra.gmra.mxu2 %vm623_vm0, %v2744_v27 }
 0x98b   : > { %v1137_v29 = vpop.f32.mrf.mxu2 }
 0x98c   : > { %v2748_v4 = vadd.f32 %v2019_v28, %v1137_v29  ;;  %v1872_v28 = vld [vmem:[%s2948_s3 + $0x38] sm:$0xff]  ;;  %v1871_v29 = vld [vmem:[%s2948_s3 + $0x30] sm:$0xff] }
 0x98e   : > { %1181 = vrot.lane.b32.xlu0 %v2748_v4, %s2338_s5  ;;  %1141 = vrot.lane.b32.xlu2 %v2748_v4, %s2339_s27  ;;  %s3008_s5 = smov 88   ;;  %s3009_s27 = smov 112  }
 0x996   : > { %1207 = vrot.lane.b32.xlu2 %v2748_v4, %s2340_s30  ;;  %s3010_s30 = smov 72  }
 0x99e   : > { %1277 = vrot.lane.b32.xlu2 %v2748_v4, %s2341_s19  ;;  %s3011_s19 = smov 56  }
 0x9a6   : > { %1343 = vrot.lane.b32.xlu2 %v2748_v4, %s3007_s23 }
 0x9e8   : > { %v1142_v30 = vpop.permute.xlu2 %1141 }
 0x9e9   : > { %1853 = vmatpush.xpose.msk.msrb.mxu1 %vm650_vm1, %v1142_v30  ;;  %v1869_v30 = vld [vmem:[%s2948_s3 + $0x20] sm:$0xff] }
 0x9ec   : > { %1854 = vmatmul.msk.f32.vlgmr.msrb.gmra.mxu1 %vm650_vm1, %v2748_v4 }
 0x9f0   : > { %v1208_v31 = vpop.permute.xlu2 %1207 }
 0x9f8   : > { %v1278_v33 = vpop.permute.xlu2 %1277 }
 0xa00   : > { %v1182_v32 = vpop.permute.xlu0 %1181  ;;  %v1344_v48 = vpop.permute.xlu2 %1343 }
 0xa01   : > { %1202 = vmatpush.msra.mxu3 %v1182_v32 }
 0xa03   : > { %1861 = vmatpush.xpose.msk.msrb.mxu3 %vm650_vm1, %v1278_v33 }
 0xa69   : > { %v1164_v34 = vpop.f32.mrf.mxu1 }
 0xa6a   : > { %v1167_v35 = vmul.f32 0.35355338, %v1164_v34 }
 0xa6c   : > { %v1168_v36 = vsel %vm650_vm1, %v1167_v35, -inf }
 0xa6d   : > { %1169 = vmax.xlane.f32.xlu1 %v1168_v36 }
 0xa86   : > { %1209 = vrot.lane.b32.xlu1 %v2748_v4, %s3008_s5 }
 0xa8e   : > { %1275 = vrot.lane.b32.xlu1 %v2748_v4, %s3009_s27  ;;  %s1664_s27 = scalar_lea.hbm %s2961_s16, %s1900_s21 }
 0xae0   : > { %v1170_v37 = vpop.xlane.xlu1 %1169 }
 0xae1   : > { %v1171_v38 = vsub.f32 %v1167_v35, %v1170_v37  ;;  %v2020_v37 = vld [vmem:[%s2949_s4 + $0x1] ss:$0 sm:$0xff] }
 0xae3   : > { %v1172_v39 = vmul.f32 1.442695, %v1171_v38 }
 0xae5   : > { %2051 = vpow2.f32 %v1172_v39 }
 0xaeb   : > { %v2052_v40 = vpop.eup %2051 }
 0xaec   : > { %v1174_v41 = vsel %vm650_vm1, %v2052_v40, 0.0 }
 0xaed   : > { %1175 = vadd.xlane.f32.xlu0 %v1174_v41 }
 0xaf8   : > { %v1210_v42 = vpop.permute.xlu1 %1209 }
 0xaf9   : > { %1857 = vmatpush.xpose.msk.msrb.mxu2 %vm650_vm1, %v1210_v42 }
 0xafc   : > { %1858 = vmatmul.msk.f32.vlgmr.msrb.gmra.mxu2 %vm650_vm1, %v1208_v31 }
 0xb00   : > { %v1276_v46 = vpop.permute.xlu1 %1275 }
 0xb01   : > { %1345 = vrot.lane.b32.xlu0 %v2748_v4, %s3010_s30  ;;  %s1665_s30 = sshll.u32 %s2621_s20, 4  ;;  %s1666_s30 = int_to_ptr.vmem [resolvable:$true] %s1665_s30 }
 0xb60   : > { %v1176_v43 = vpop.xlane.xlu0 %1175 }
 0xb61   : > { %2053 = vrcp.f32 %v1176_v43 }
 0xb67   : > { %v2054_v44 = vpop.eup %2053 }
 0xb68   : > { %v1178_v45 = vmul.f32 %v2054_v44, %v2052_v40 }
 0xb6a   : > { %1855 = vst.msk [vmem:[%s2621_s20 + $0x20] sm:$0xff] %vm650_vm1, %v1178_v45  ;;  %1856 = vmatmul.msk.f32.vlgmr.msra.gmra.mxu3 %vm650_vm1, %v1178_v45 }
 0xb6b   : > { %1451 = vmatpush.msra.mxu3 %v1872_v28 }
 0xb6d   : > { %1452 = vmatpush.msra.mxu3 %v1871_v29 }
 0xb72   : > { %1862 = vmatmul.msk.f32.vlgmr.msrb.gmra.mxu3 %vm650_vm1, %v1276_v46 }
 0xb73   : > { %v1346_v47 = vpop.permute.xlu0 %1345 }
 0xb74   : > { %1865 = vmatpush.xpose.msk.msra.mxu2 %vm650_vm1, %v1346_v47  ;;  %v1879_v47 = vld [vmem:[%s2952_s7 + $0x38] sm:$0xff] }
 0xb77   : > { %1866 = vmatmul.msk.f32.vlgmr.msra.gmra.mxu2 %vm650_vm1, %v1344_v48  ;;  %v1877_v48 = vld [vmem:[%s2952_s7 + $0x28] sm:$0xff] }
 0xb7f   : > { %v1232_v49 = vpop.f32.mrf.mxu2 }
 0xb80   : > { %v1235_v50 = vmul.f32 0.35355338, %v1232_v49  ;;  %v1876_v49 = vld [vmem:[%s2952_s7 + $0x20] sm:$0xff] }
 0xb82   : > { %v1236_v51 = vsel %vm650_vm1, %v1235_v50, -inf }
 0xb83   : > { %1237 = vmax.xlane.f32.xlu0 %v1236_v51  ;;  %v1887_v51 = vld [vmem:[%s2954_s9 + $0x70] sm:$0xff] }
 0xbed   : > { %v2781_v52 = vpop.f32.mrf.mxu3 }
 0xbf5   : > { %v1300_v53 = vpop.f32.mrf.mxu3 }
 0xbf6   : > { %v1303_v54 = vmul.f32 0.35355338, %v1300_v53  ;;  %v1238_v55 = vpop.xlane.xlu0 %1237 }
 0xbf7   : > { %v1239_v56 = vsub.f32 %v1235_v50, %v1238_v55  ;;  %v1888_v50 = vld [vmem:[%s2954_s9 + $0x78] sm:$0xff]  ;;  %v1885_v55 = vld [vmem:[%s2954_s9 + $0x60] sm:$0xff] }
 0xbf8   : > { %v1304_v57 = vsel %vm650_vm1, %v1303_v54, -inf  ;;  %1553 = vmatpush.msrb.mxu2 %v1888_v50 }
 0xbf9   : > { %v1240_v58 = vmul.f32 1.442695, %v1239_v56  ;;  %1305 = vmax.xlane.f32.xlu1 %v1304_v57  ;;  %v1884_v57 = vld [vmem:[%s2954_s9 + $0x58] sm:$0xff] }
 0xbfa   : > { %v1368_v59 = vpop.f32.mrf.mxu2  ;;  %1554 = vmatpush.msrb.mxu2 %v1887_v51 }
 0xbfb   : > { %2055 = vpow2.f32 %v1240_v58  ;;  %v1371_v60 = vmul.f32 0.35355338, %v1368_v59 }
 0xbfd   : > { %v1372_v61 = vsel %vm650_vm1, %v1371_v60, -inf }
 0xbfe   : > { %1373 = vmax.xlane.f32.xlu2 %v1372_v61 }
 0xc01   : > { %v2056_v62 = vpop.eup %2055 }
 0xc02   : > { %v1242_v63 = vsel %vm650_vm1, %v2056_v62, 0.0 }
 0xc03   : > { %1243 = vadd.xlane.f32.xlu0 %v1242_v63 }
 0xc17   : > { %1249 = vrot.lane.b32.xlu0 %v2748_v4, %s3011_s19  ;;  %s1667_s19 = sshll.u32 %s1664_s27, 4  ;;  %s1668_s19 = int_to_ptr.hbm [resolvable:$true] %s1667_s19 }
 0xc6c   : > { %v1306_v0 = vpop.xlane.xlu1 %1305 }
 0xc6d   : > { %v1307_v1 = vsub.f32 %v1303_v54, %v1306_v0  ;;  %v2021_v0 = vld [vmem:[#allocation7 + $0x1] ss:$0 sm:$0xff] }
 0xc6f   : > { %v1308_v2 = vmul.f32 1.442695, %v1307_v1 }
 0xc71   : > { %2057 = vpow2.f32 %v1308_v2  ;;  %v1374_v3 = vpop.xlane.xlu2 %1373 }
 0xc72   : > { %v1375_v5 = vsub.f32 %v1371_v60, %v1374_v3  ;;  %v2022_v3 = vld [vmem:[%s2951_s6 + $0x1] ss:$0 sm:$0xff] }
 0xc74   : > { %v1376_v6 = vmul.f32 1.442695, %v1375_v5 }
 0xc76   : > { %2059 = vpow2.f32 %v1376_v6  ;;  %v1244_v7 = vpop.xlane.xlu0 %1243 }
 0xc77   : > { %v2058_v8 = vpop.eup %2057  ;;  %2061 = vrcp.f32 %v1244_v7  ;;  %v1883_v7 = vld [vmem:[%s2954_s9 + $0x50] sm:$0xff] }
 0xc78   : > { %v1310_v9 = vsel %vm650_vm1, %v2058_v8, 0.0 }
 0xc79   : > { %1311 = vadd.xlane.f32.xlu1 %v1310_v9  ;;  %v1881_v9 = vld [vmem:[%s2954_s9 + $0x40] sm:$0xff] }
 0xc7c   : > { %v2060_v10 = vpop.eup %2059 }
 0xc7d   : > { %v2062_v11 = vpop.eup %2061  ;;  %v1378_v12 = vsel %vm650_vm1, %v2060_v10, 0.0 }
 0xc7e   : > { %v1246_v13 = vmul.f32 %v2062_v11, %v2056_v62  ;;  %1379 = vadd.xlane.f32.xlu2 %v1378_v12 }
 0xc80   : > { %1859 = vst.msk [vmem:[%s2621_s20 + $0x28] sm:$0xff] %vm650_vm1, %v1246_v13 }
 0xc89   : > { %v1250_v14 = vpop.permute.xlu0 %1249 }
 0xc8a   : > { %1270 = vmatpush.msra.mxu1 %v1250_v14  ;;  %v2024_v14 = vld [vmem:[%s2955_s10 + $0x1] ss:$0 sm:$0xff] }
 0xc8b   : > { %1860 = vmatmul.msk.f32.vlgmr.msra.gmra.mxu1 %vm650_vm1, %v1246_v13 }
 0xc92   : > { %1317 = vrot.lane.b32.xlu1 %v2748_v4, %s3012_s0  ;;  %s1639_s0 = scalar_lea.sflag [#allocation13], %s2556_s17 }
 0xc96   : > { %1385 = vrot.lane.b32.xlu2 %v2748_v4, %s3013_s2  ;;  %v1870_v4 = vld [vmem:[%s2948_s3 + $0x28] sm:$0xff]  ;;  %s2237_s2 = sshra.s32 %s1668_s19, 4  ;;  %s2238_s2 = int_to_ptr.hbm [resolvable:$true] %s2237_s2 }
 0xc97   : > { %1453 = vmatpush.msra.mxu3 %v1870_v4  ;;  %p2244_p12 = scmp.lt.s32.totalorder %s2238_s2, %s2961_s16 }
 0xc99   : > { %1454 = vmatpush.msra.mxu3 %v1869_v30 }
 0xcec   : > { %v1312_v15 = vpop.xlane.xlu1 %1311 }
 0xced   : > { %2063 = vrcp.f32 %v1312_v15 }
 0xcf1   : > { %v1380_v16 = vpop.xlane.xlu2 %1379 }
 0xcf2   : > { %2065 = vrcp.f32 %v1380_v16 }
 0xcf3   : > { %v2064_v17 = vpop.eup %2063 }
 0xcf4   : > { %v1314_v18 = vmul.f32 %v2064_v17, %v2058_v8  ;;  %v1882_v8 = vld [vmem:[%s2954_s9 + $0x48] sm:$0xff] }
 0xcf6   : > { %1863 = vst.msk [vmem:[%s2621_s20 + $0x30] sm:$0xff] %vm650_vm1, %v1314_v18 }
 0xcf8   : > { %v2066_v19 = vpop.eup %2065 }
 0xcf9   : > { %v1382_v20 = vmul.f32 %v2066_v19, %v2060_v10  ;;  %v1386_v21 = vpop.permute.xlu2 %1385  ;;  %v2023_v10 = vld [vmem:[#allocation8 + $0x1] ss:$0 sm:$0xff] }
 0xcfa   : > { %1406 = vmatpush.msrb.mxu1 %v1386_v21 }
 0xcfb   : > { %1867 = vst.msk [vmem:[%s2621_s20 + $0x38] sm:$0xff] %vm650_vm1, %v1382_v20  ;;  %1868 = vmatmul.msk.f32.vlgmr.msrb.gmra.mxu1 %vm650_vm1, %v1382_v20 }
 0xd04   : > { %v1318_v22 = vpop.permute.xlu1 %1317 }
 0xd05   : > { %1338 = vmatpush.msrb.mxu0 %v1318_v22 }
 0xd06   : > { %1864 = vmatmul.msk.f32.vlgmr.msrb.gmra.mxu0 %vm650_vm1, %v1314_v18 }
 0xd07   : > { %1519 = vmatpush.msra.mxu0 %v1879_v47 }
 0xd08   : > { %v1272_v23 = vpop.f32.mrf.mxu1 }
 0xd09   : > { %1412 = vrot.lane.b32.xlu0 %v1272_v23, %s3014_s8 }
 0xd78   : > { %v1408_v24 = vpop.f32.mrf.mxu1 }
 0xd79   : > { %1420 = vrot.lane.b32.xlu1 %v1408_v24, %s3015_s26  ;;  %s2239_s26 = scalar_lea.hbm %s2238_s2, 64 }
 0xd7a   : > { %p2240_p1 = scmp.ne.s32.totalorder %s2238_s2, %s2239_s26  ;;  %p2245_p7 = scmp.lt.s32.totalorder %s2243_s29, %s2239_s26 }
 0xd7b   : > { %v1413_v31 = vpop.permute.xlu0 %1412 }
 0xd7c   : > { %v1423_v32 = vsel %vm650_vm1, %v2781_v52, %v1413_v31  ;;  %v1886_v52 = vld [vmem:[%s2954_s9 + $0x68] sm:$0xff]  ;;  %p2241_p3 = pnand %p2240_p1, %p2525_p4  ;;  %p2246_p8 = por %p2245_p7, %p2244_p12 }
 0xd7d   : > { %1555 = vmatpush.msrb.mxu2 %v1886_v52 }
 0xd7e   : > { %p2242_p5 = pneg %p2241_p3 }
 0xd7f   : > { %1556 = vmatpush.msrb.mxu2 %v1885_v55 }
 0xd80   : > { %p2247_p9 = pnand %p2246_p8, %p2242_p5 }
 0xd81   : > { %1557 = vmatpush.msrb.mxu2 %v1884_v57 }
 0xd83   : > { %v1340_v26 = vpop.f32.mrf.mxu0  ;;  %1558 = vmatpush.msrb.mxu2 %v1883_v7 }
 0xd84   : > { %1416 = vrot.lane.b32.xlu0 %v1340_v26, %s3016_s13 }
 0xd85   : > { %1559 = vmatpush.msrb.mxu2 %v1882_v8 }
 0xd87   : > { %1560 = vmatpush.msrb.mxu2 %v1881_v9 }
 0xdeb   : > { %v1421_v34 = vpop.permute.xlu1 %1420 }
 0xdf6   : > { %v1417_v33 = vpop.permute.xlu0 %1416 }
 0xdf7   : > { %v1424_v35 = vsel %vm931_vm2, %v1423_v32, %v1417_v33 }
 0xdf8   : > { %v1425_v36 = vsel %vm933_vm3, %v1424_v35, %v1421_v34  ;;  %v2025_v34 = vld [vmem:[%s2956_s11 + $0x1] ss:$0 sm:$0xff] }
 0xdf9   : > { %1874 = vmatmul.msk.f32.vlgmr.msra.gmra.mxu3 %vm623_vm0, %v1425_v36 }
 0xe7c   : > { %v1456_v38 = vpop.f32.mrf.mxu3 }
 0xe7d   : > { %v1457_v39 = vadd.f32 %v2020_v37, %v1456_v38  ;;  %v2026_v37 = vld [vmem:[%s2957_s12 + $0x1] ss:$0 sm:$0xff] }
 0xe7f   : > { %v1459_v40 = vadd.f32 %v1457_v39, %v2744_v27  ;;  %v1878_v27 = vld [vmem:[%s2952_s7 + $0x30] sm:$0xff] }
 0xe80   : > { %1520 = vmatpush.msra.mxu0 %v1878_v27 }
 0xe81   : > { %v1464_v41 = vsel %vm623_vm0, %v1459_v40, 0.0 }
 0xe82   : > { %1465 = vadd.xlane.f32.xlu2 %v1464_v41  ;;  %1521 = vmatpush.msra.mxu0 %v1877_v48 }
 0xe84   : > { %1522 = vmatpush.msra.mxu0 %v1876_v49 }
 0xef5   : > { %v1466_v42 = vpop.xlane.xlu2 %1465 }
 0xef6   : > { %v1467_v43 = vmul.f32 %v1466_v42, %v2673_v25 }
 0xef8   : > { %v1468_v44 = vsub.f32 %v1459_v40, %v1467_v43 }
 0xefa   : > { %v1469_v45 = vmul.f32 %v1468_v44, %v1468_v44 }
 0xefc   : > { %v1470_v46 = vsel %vm623_vm0, %v1469_v45, 0.0 }
 0xefd   : > { %1471 = vadd.xlane.f32.xlu0 %v1470_v46 }
 0xf70   : > { %v1472_v53 = vpop.xlane.xlu0 %1471 }
 0xf71   : > { %v1473_v54 = vmul.f32 %v1472_v53, %v2673_v25 }
 0xf73   : > { %v1474_v56 = vadd.f32 1e-05, %v1473_v54 }
 0xf75   : > { %2067 = vrsqrt.f32 %v1474_v56  ;;  %vm1481_vm13 = vweird.f32 %v1474_v56 }
 0xf7b   : > { %v2068_v58 = vpop.eup %2067 }
 0xf7c   : > { %v1476_v59 = vmul.f32 %v2068_v58, %v1474_v56  ;;  %vm1482_vm12 = vweird.f32 %v2068_v58 }
 0xf7d   : > { %vm1483_vm14 = vmor %vm1481_vm13, %vm1482_vm12 }
 0xf7e   : > { %v1477_v60 = vmul.f32 %v2068_v58, %v1476_v59 }
 0xf80   : > { %v1478_v61 = vmul.f32 0.5, %v1477_v60 }
 0xf82   : > { %v1479_v62 = vsub.f32 1.5, %v1478_v61 }
 0xf84   : > { %v1480_v63 = vmul.f32 %v2068_v58, %v1479_v62 }
 0xf86   : > { %v1484_v1 = vsel %vm1483_vm14, %v2068_v58, %v1480_v63 }
 0xf87   : > { %v1485_v2 = vmul.f32 %v1484_v1, %v1468_v44 }
 0xf89   : > { %v1489_v5 = vmul.f32 %v2021_v0, %v1485_v2 }
 0xf8b   : > { %v1493_v6 = vadd.f32 %v2022_v3, %v1489_v5 }
 0xf8d   : > { %1880 = vmatmul.msk.f32.vlgmr.msra.gmra.mxu0 %vm623_vm0, %v1493_v6 }
0x100a   : > { %v1524_v11 = vpop.f32.mrf.mxu0 }
0x100b   : > { %v1525_v12 = vadd.f32 %v2023_v10, %v1524_v11 }
0x100d   : > { %v1527_v13 = vmax.f32 %v1525_v12, 0.0 }
0x100f   : > { %1890 = vmatmul.msk.f32.vlgmr.msrb.gmra.mxu2 %vm1050_vm8, %v1527_v13 }
0x1092   : > { %v1562_v15 = vpop.f32.mrf.mxu2 }
0x1093   : > { %v1563_v16 = vadd.f32 %v2024_v14, %v1562_v15 }
0x1095   : > { %v1565_v17 = vadd.f32 %v1563_v16, %v1493_v6 }
0x1097   : > { %v1570_v18 = vsel %vm623_vm0, %v1565_v17, 0.0 }
0x1098   : > { %1571 = vadd.xlane.f32.xlu1 %v1570_v18 }
0x110b   : > { %v1572_v19 = vpop.xlane.xlu1 %1571 }
0x110c   : > { %v1573_v20 = vmul.f32 %v1572_v19, %v2673_v25 }
0x110e   : > { %v1574_v21 = vsub.f32 %v1565_v17, %v1573_v20 }
0x1110   : > { %v1575_v22 = vmul.f32 %v1574_v21, %v1574_v21 }
0x1112   : > { %v1576_v23 = vsel %vm623_vm0, %v1575_v22, 0.0 }
0x1113   : > { %1577 = vadd.xlane.f32.xlu2 %v1576_v23 }
0x1186   : > { %v1578_v24 = vpop.xlane.xlu2 %1577 }
0x1187   : > { %v1579_v26 = vmul.f32 %v1578_v24, %v2673_v25 }
0x1189   : > { %v1580_v28 = vadd.f32 1e-05, %v1579_v26 }
0x118b   : > { %2069 = vrsqrt.f32 %v1580_v28  ;;  %vm1587_vm1 = vweird.f32 %v1580_v28 }
0x1191   : > { %v2070_v29 = vpop.eup %2069 }
0x1192   : > { %v1582_v4 = vmul.f32 %v2070_v29, %v1580_v28  ;;  %vm1588_vm15 = vweird.f32 %v2070_v29 }
0x1193   : > { %vm1589_vm2 = vmor %vm1587_vm1, %vm1588_vm15 }
0x1194   : > { %v1583_v30 = vmul.f32 %v2070_v29, %v1582_v4 }
0x1196   : > { %v1584_v31 = vmul.f32 0.5, %v1583_v30 }
0x1198   : > { %v1585_v32 = vsub.f32 1.5, %v1584_v31 }
0x119a   : > { %v1586_v33 = vmul.f32 %v2070_v29, %v1585_v32 }
0x119c   : > { %v1590_v35 = vsel %vm1589_vm2, %v2070_v29, %v1586_v33 }
0x119d   : > { %v1591_v36 = vmul.f32 %v1590_v35, %v1574_v21 }
0x119f   : > { %v1595_v38 = vmul.f32 %v2025_v34, %v1591_v36 }
0x11a1   : > { %v1599_v39 = vadd.f32 %v2026_v37, %v1595_v38 }
0x11a3   : > { %v1602_v40 = vsel %vm623_vm0, %v1599_v39, 0.0 }
0x11a4   : > { %1603 = vadd.xlane.f32.xlu0 %v1602_v40 }
0x1217   : > { %v1604_v41 = vpop.xlane.xlu0 %1603 }
0x1218   : > { %v1605_v42 = vmul.f32 %v1604_v41, %v2673_v25 }
0x121a   : > { %v1606_v43 = vsub.f32 %v1599_v39, %v1605_v42 }
0x121c   : > { %v1607_v44 = vmul.f32 %v1606_v43, %v1606_v43 }
0x121e   : > { %v1608_v45 = vsel %vm623_vm0, %v1607_v44, 0.0 }
0x121f   : > { %1609 = vadd.xlane.f32.xlu1 %v1608_v45 }
0x1220   : > { %2250 = shalt.err (!%p2247_p9)
}
0x1221   : > { %s2352_s20 = smov 128   ;;  %s1895_s1 = sshll.u32 %s2462_s28, 3  ;;  %v2028_v56 = vld [vmem:[#allocation10] ss:$0 sm:$0xff] }
0x1222   : > { %1920 = dma.vmem_to_hbm [thread:$0]  (%p2525_p4), %s1666_s30, 1024, %s1668_s19, %s1639_s0, %s2352_s20, %s2352_s20, %s3014_s8  }
0x1223   : > { %s3017_s5 = sld [smem:[#allocation29_spill]]  ;;  %s3019_s0 = sshll.u32 %s2556_s17, 3 }
0x1224   : > { %s3018_s30 = sld [smem:[#allocation31_spill]]  ;;  %s606_s2 = scalar_lea.vmem [#allocation11], %s3019_s0 }
0x1225   : > { %s1651_s26 = sshll.u32 %s606_s2, 4  ;;  %s1634_s13 = scalar_lea.sflag [#allocation4], %s2556_s17  ;;  %s1652_s26 = int_to_ptr.vmem [resolvable:$true] %s1651_s26 }
0x1229   : > { %v2027_v54 = vld [vmem:[%s3017_s5] ss:$0 sm:$0xff] }
0x122a   : > { %s1649_s19 = scalar_lea.hbm %s3018_s30, %s1895_s1  ;;  %s2271_s1 = scalar_lea.hbm %s3018_s30, 16 }
0x122b   : > { %s1653_s28 = sshll.u32 %s1649_s19, 4  ;;  %s1654_s28 = int_to_ptr.hbm [resolvable:$true] %s1653_s28 }
0x122c   : > { %s2265_s15 = sshra.s32 %s1654_s28, 4  ;;  %s2266_s15 = int_to_ptr.hbm [resolvable:$true] %s2265_s15 }
0x122d   : > { %s2267_s29 = scalar_lea.hbm %s2266_s15, 8  ;;  %p2272_p0 = scmp.lt.s32.totalorder %s2266_s15, %s3018_s30 }
0x122e   : > { %p2268_p10 = scmp.ne.s32.totalorder %s2266_s15, %s2267_s29  ;;  %p2273_p2 = scmp.lt.s32.totalorder %s2271_s1, %s2267_s29 }
0x1230   : > { %p2269_p13 = pnand %p2268_p10, %p2525_p4  ;;  %p2274_p1 = por %p2273_p2, %p2272_p0 }
0x1232   : > { %p2270_p11 = pneg %p2269_p13 }
0x1234   : > { %p2275_p3 = pnand %p2274_p1, %p2270_p11 }
0x1292   : > { %v1610_v46 = vpop.xlane.xlu1 %1609 }
0x1293   : > { %v1611_v47 = vmul.f32 %v1610_v46, %v2673_v25 }
0x1295   : > { %v1612_v27 = vadd.f32 1e-05, %v1611_v47 }
0x1297   : > { %2071 = vrsqrt.f32 %v1612_v27  ;;  %vm1619_vm4 = vweird.f32 %v1612_v27 }
0x129d   : > { %v2072_v48 = vpop.eup %2071 }
0x129e   : > { %v1614_v49 = vmul.f32 %v2072_v48, %v1612_v27  ;;  %vm1620_vm3 = vweird.f32 %v2072_v48 }
0x129f   : > { %vm1621_vm5 = vmor %vm1619_vm4, %vm1620_vm3 }
0x12a0   : > { %v1615_v50 = vmul.f32 %v2072_v48, %v1614_v49 }
0x12a2   : > { %v1616_v51 = vmul.f32 0.5, %v1615_v50 }
0x12a4   : > { %v1617_v52 = vsub.f32 1.5, %v1616_v51 }
0x12a6   : > { %v1618_v53 = vmul.f32 %v2072_v48, %v1617_v52 }
0x12a8   : > { %v1622_v25 = vsel %vm1621_vm5, %v2072_v48, %v1618_v53 }
0x12a9   : > { %v1623_v55 = vmul.f32 %v1622_v25, %v1606_v43 }
0x12ab   : > { %v1627_v57 = vmul.f32 %v2027_v54, %v1623_v55 }
0x12ad   : > { %v1631_v58 = vadd.f32 %v2028_v56, %v1627_v57 }
0x12af   : > { %1632 = vst.msk [vmem:[%s606_s2] sm:$0xff] %vm623_vm0, %v1631_v58 }
0x12b0   : > { %2278 = shalt.err (!%p2275_p3)
}
0x12b1   : > { %1919 = dma.vmem_to_hbm [thread:$0]  (%p2525_p4), %s1652_s26, 128, %s1654_s28, %s1634_s13  }
0x12b2 PF: > { %s3020_s17 = sld [smem:[#allocation19_spill]]  ;;  %p3022_p5 = scmp.ge.s32.totalorder %s2329_s24, 2 }
0x12b4   : > { %p1941_p12 = pnand %p3022_p5, %p2529_p6 }
0x12b6   : > { %p1942_p7 = pneg %p1941_p12 }
0x12b8   : > { %s1682_s8 = sand.u32 1, %s3020_s17  }
0x12b9   : > { %s1683_s27 = scalar_lea.sflag [#allocation4], %s1682_s8 }
0x12ba   : > { %2308 = dma.done.wait (%p1942_p7), %s1683_s27, 128  }
0x12bb   : > { %2310 = vsyncadd (%p1942_p7), %s1683_s27, 4294967168  ;;  %s1693_s19 = scalar_lea.sflag [#allocation13], %s1682_s8 }
0x12bc   : > { %2312 = dma.done.wait (%p1942_p7), %s1693_s19, 1024  }
0x12bd   : > { %2314 = vsyncadd (%p1942_p7), %s1693_s19, 4294966272  ;;  %s3023_s24 = sld [smem:[#allocation21_spill]]  ;;  %s3026_s21 = smov %s2321_s22 }
0x12be   : > { %s3024_s0 = sld [smem:[#allocation20_spill]] }
0x12bf   : > { %s3025_s23 = sld [smem:[#allocation22_spill]] }
0x12c3   : > { %p35_p4 = scmp.ge.s32.totalorder %s3023_s24, 4  }
0x12c4   : > { %s3027_s22 = smov %s3024_s0 }
0x12c5   :  { %37 = sbr.rel (!%p35_p4) target bundleno = 18 (0x12), region = 177 }
0x12ca   :  { %1699 = vsyncpa [#allocation3], 1 }
0x12cb   :  { %1701 = vsyncpa [#allocation3 + $0x1], 1 }
0x12cc   :  { %1702 = vsyncpa [#allocation6], 1 }
0x12cd   :  { %1703 = vsyncpa [#allocation9], 1 }
0x12ce   :  { %1704 = vsyncpa [#allocation4], 1 }
0x12cf   :  { %1706 = vsyncpa [#allocation4 + $0x1], 1 }
0x12d0   :  { %1707 = vsyncpa [#allocation13], 1 }
0x12d1   :  { %1709 = vsyncpa [#allocation13 + $0x1], 1 }

</bundles_post_ra>
